<compile_context>
chip_gen: v6e
topology: v6e:2x2x1
jax: 0.10.0
libtpu: 0.0.40
codegen_flags: <defaults>
</compile_context>

<pallas_src>
import functools

import jax
import jax.numpy as jnp
from jax.experimental import pallas as pl
from jax.experimental.pallas import tpu as pltpu


# ----------------------------------------------------------------------------
# Fused SAGEConv layer kernel (+ optional ReLU or log_softmax epilogue)
# ----------------------------------------------------------------------------
def _sage_kernel(a_ref, xk_ref, xs_ref, wl_ref, wr_ref, b_ref, o_ref, acc_ref,
                 *, relu, log_softmax, n_valid):
    k = pl.program_id(1)

    @pl.when(k == 0)
    def _():
        acc_ref[...] = jnp.zeros_like(acc_ref)

    # Neighbor sum-aggregation: accumulate A_tile @ X_tile into the f32 scratch.
    # A arrives as bf16 (exact for 0/1); X stays f32 so results match f32 math.
    # TODO(synk): block-sparse skipping of all-zero A tiles (scalar-prefetched
    # per-(i,k) nonzero mask + data-dependent index_map) for ~10x on sparse graphs.
    acc_ref[...] += jnp.dot(a_ref[...].astype(jnp.float32), xk_ref[...],
                            preferred_element_type=jnp.float32)

    @pl.when(k == pl.num_programs(1) - 1)
    def _():
        agg = acc_ref[...]          # [TM, Fin] f32  (A @ X row tile)
        xs = xs_ref[...]            # [TM, Fin] f32  (self features)
        # lin_l(agg) + lin_r(x) + b   (weights are padded to 128 output lanes)
        h = (jnp.dot(agg, wl_ref[...], preferred_element_type=jnp.float32)
             + jnp.dot(xs, wr_ref[...], preferred_element_type=jnp.float32)
             + b_ref[...])
        if relu:
            h = jnp.maximum(h, 0.0)
        if log_softmax:
            # mask padded class lanes before the max / logsumexp reduction
            lane = jax.lax.broadcasted_iota(jnp.int32, h.shape, 1)
            h = jnp.where(lane < n_valid, h, -1e30)
            m = jnp.max(h, axis=-1, keepdims=True)
            lse = jnp.log(jnp.sum(jnp.exp(h - m), axis=-1, keepdims=True)) + m
            h = h - lse
        o_ref[...] = h.astype(o_ref.dtype)


def _round_up(x, m):
    return (x + m - 1) // m * m


def _pick_tile(n, candidates):
    for c in candidates:
        if c <= n and n % c == 0:
            return c
    return n


def sage_conv(a_bf16, x, w_l, w_r, b, *, relu, log_softmax=False):
    """One SAGEConv layer.

    a_bf16:[N,N] bf16, x:[N,Fin] f32, w_l/w_r:[Fin,Fout], b:[1,Fout].
    Returns [N,Fout] f32.
    """
    n, f_in = x.shape
    f_out = w_l.shape[1]
    f_out_p = _round_up(f_out, 128)           # lane-dense output store
    n_p = _round_up(n, 128)

    # Tile sizes: modest TM (f32 acc stays small; v5e-friendly), larger TK.
    # Double-buffered bf16 A tiles + X/out buffers stay well under the scoped
    # VMEM default on every generation (v5e 16 MiB, v7x 32 MiB).
    tm = _pick_tile(n_p, (256, 128))
    tk = _pick_tile(n_p, (1024, 512, 256, 128))
    grid = (n_p // tm, n_p // tk)

    # Zero-pad: extra rows/cols of A and rows of X are zero so they do not
    # perturb real rows; padded output rows/cols are sliced off below.
    a_p = jnp.pad(a_bf16, ((0, n_p - n), (0, n_p - n)))
    x_p = jnp.pad(x, ((0, n_p - n), (0, 0)))
    w_l_p = jnp.pad(w_l, ((0, 0), (0, f_out_p - f_out)))
    w_r_p = jnp.pad(w_r, ((0, 0), (0, f_out_p - f_out)))
    b_p = jnp.pad(b, ((0, 0), (0, f_out_p - f_out)))

    kernel = functools.partial(_sage_kernel, relu=relu,
                               log_softmax=log_softmax, n_valid=f_out)

    flops = 2 * n_p * n_p * f_in + 4 * n_p * f_in * f_out_p
    transcendentals = n_p * f_out_p if log_softmax else 0
    bytes_accessed = (a_p.size * a_p.dtype.itemsize
                      + x_p.size * x_p.dtype.itemsize * (grid[0] + 1)
                      + n_p * f_out_p * 4
                      + (w_l_p.size + w_r_p.size + b_p.size) * 4)

    out = pl.pallas_call(
        kernel,
        out_shape=jax.ShapeDtypeStruct((n_p, f_out_p), jnp.float32),
        grid=grid,
        in_specs=[
            pl.BlockSpec((tm, tk), lambda i, k: (i, k)),        # A tile
            pl.BlockSpec((tk, f_in), lambda i, k: (k, 0)),      # X (neighbors)
            pl.BlockSpec((tm, f_in), lambda i, k: (i, 0)),      # X (self rows)
            pl.BlockSpec((f_in, f_out_p), lambda i, k: (0, 0)),  # W_l (padded)
            pl.BlockSpec((f_in, f_out_p), lambda i, k: (0, 0)),  # W_r (padded)
            pl.BlockSpec((1, f_out_p), lambda i, k: (0, 0)),     # bias (padded)
        ],
        out_specs=pl.BlockSpec((tm, f_out_p), lambda i, k: (i, 0)),
        scratch_shapes=[pltpu.VMEM((tm, f_in), jnp.float32)],
        compiler_params=pltpu.CompilerParams(
            dimension_semantics=("parallel", "arbitrary")),
        cost_estimate=pl.CostEstimate(
            flops=flops,
            transcendentals=transcendentals,
            bytes_accessed=bytes_accessed),
    )(a_p, x_p, x_p, w_l_p, w_r_p, b_p)

    return out[:n, :f_out]


def net_forward(x, adj, params):
    """Full Net.forward (inference)."""
    # bf16 adjacency is exact for 0/1 entries and halves the dominant HBM stream.
    adj_bf16 = adj.astype(jnp.bfloat16)
    h = sage_conv(adj_bf16, x, params["w1_l"], params["w1_r"], params["b1"],
                  relu=True)
    # TODO(synk): F.dropout(training=self.training) — identity at inference.
    out = sage_conv(adj_bf16, h, params["w2_l"], params["w2_r"], params["b2"],
                    relu=False, log_softmax=True)
    return out


def init_params(key, num_features, embedding_size, num_classes):
    ks = jax.random.split(key, 4)

    def glorot(k, fan_in, fan_out):
        scale = jnp.sqrt(6.0 / (fan_in + fan_out))
        return jax.random.uniform(k, (fan_in, fan_out), jnp.float32,
                                  -scale, scale)

    return {
        "w1_l": glorot(ks[0], num_features, embedding_size),
        "w1_r": glorot(ks[1], num_features, embedding_size),
        "b1": jnp.zeros((1, embedding_size), jnp.float32),
        "w2_l": glorot(ks[2], embedding_size, num_classes),
        "w2_r": glorot(ks[3], embedding_size, num_classes),
        "b2": jnp.zeros((1, num_classes), jnp.float32),
    }


if __name__ == "__main__":
    NUM_NODES = 384          # exercises a 3x3 tiled grid (tm=tk=128)
    NUM_FEATURES = 16
    EMBEDDING_SIZE = 32
    NUM_CLASSES = 8

    key = jax.random.PRNGKey(0)
    k_x, k_adj, k_p = jax.random.split(key, 3)

    # node features
    x = jax.random.normal(k_x, (NUM_NODES, NUM_FEATURES), jnp.float32)
    # synthetic sparse adjacency (adj_t), materialized dense for the kernel
    adj = (jax.random.uniform(k_adj, (NUM_NODES, NUM_NODES)) < 0.1).astype(
        jnp.float32)

    params = init_params(k_p, NUM_FEATURES, EMBEDDING_SIZE, NUM_CLASSES)

    fwd = jax.jit(net_forward)
    out = fwd(x, adj, params)
    out = jax.block_until_ready(out)

    # sanity check against a pure-JAX high-precision reference
    def ref(x, adj, p):
        hp = jax.lax.Precision.HIGHEST
        h = (jnp.dot(jnp.dot(adj, x, precision=hp), p["w1_l"], precision=hp)
             + jnp.dot(x, p["w1_r"], precision=hp) + p["b1"])
        h = jnp.maximum(h, 0.0)
        o = (jnp.dot(jnp.dot(adj, h, precision=hp), p["w2_l"], precision=hp)
             + jnp.dot(h, p["w2_r"], precision=hp) + p["b2"])
        return jax.nn.log_softmax(o, axis=1)

    ref_out = ref(x, adj, params)
    assert out.shape == (NUM_NODES, NUM_CLASSES)
    assert jnp.allclose(out, ref_out, atol=1e-2, rtol=1e-2)

    print("KERNEL_OK")
</pallas_src>

<mosaic_0001>
module attributes {stable_mosaic.version = 11 : i64} {
  func.func @_sage_kernel(%arg0: i32, %arg1: i32, %arg2: memref<128x128xbf16, #tpu.memory_space<vmem>>, %arg3: memref<128x16xf32, #tpu.memory_space<vmem>>, %arg4: memref<128x16xf32, #tpu.memory_space<vmem>>, %arg5: memref<16x128xf32, #tpu.memory_space<vmem>>, %arg6: memref<16x128xf32, #tpu.memory_space<vmem>>, %arg7: memref<1x128xf32, #tpu.memory_space<vmem>>, %arg8: memref<128x128xf32, #tpu.memory_space<vmem>>, %arg9: memref<128x16xf32, #tpu.memory_space<vmem>>) attributes {dimension_semantics = [#tpu.dimension_semantics<parallel>, #tpu.dimension_semantics<arbitrary>], iteration_bounds = array<i64: 3, 3>, scalar_prefetch = 0 : i64, scratch_operands = 1 : i64, tpu.core_type = #tpu.core_type<tc>, window_params = [{transform_indices = @transform_0, window_bounds = array<i64: 128, 128>}, {transform_indices = @transform_1, window_bounds = array<i64: 128, 16>}, {transform_indices = @transform_2, window_bounds = array<i64: 128, 16>}, {pipeline_mode = #tpu.pipeline_mode<synchronous>, transform_indices = @transform_3, window_bounds = array<i64: 16, 128>}, {pipeline_mode = #tpu.pipeline_mode<synchronous>, transform_indices = @transform_4, window_bounds = array<i64: 16, 128>}, {pipeline_mode = #tpu.pipeline_mode<synchronous>, transform_indices = @transform_5, window_bounds = array<i64: 1, 128>}, {transform_indices = @transform_6, window_bounds = array<i64: 128, 128>}]} {
    %c0_i32 = arith.constant 0 : i32
    %0 = arith.cmpi eq, %arg1, %c0_i32 : i32
    %1 = arith.extui %0 : i1 to i32
    %c0_i32_0 = arith.constant 0 : i32
    %2 = arith.cmpi ne, %1, %c0_i32_0 : i32
    scf.if %2 {
      %cst_9 = arith.constant 0.000000e+00 : f32
      %13 = vector.broadcast %cst_9 : f32 to vector<128x16xf32>
      %c0_10 = arith.constant 0 : index
      %c0_11 = arith.constant 0 : index
      %14 = vector.load %arg9[%c0_10, %c0_11] : memref<128x16xf32, #tpu.memory_space<vmem>>, vector<128x16xf32>
      tpu.vector_store %arg9[%c0_10, %c0_11], %13 {strides = array<i32>} : memref<128x16xf32, #tpu.memory_space<vmem>>, vector<128x16xf32>,
    } else {
    }
    %c0 = arith.constant 0 : index
    %c0_1 = arith.constant 0 : index
    %3 = vector.load %arg9[%c0, %c0_1] : memref<128x16xf32, #tpu.memory_space<vmem>>, vector<128x16xf32>
    %c0_2 = arith.constant 0 : index
    %c0_3 = arith.constant 0 : index
    %4 = vector.load %arg2[%c0_2, %c0_3] : memref<128x128xbf16, #tpu.memory_space<vmem>>, vector<128x128xbf16>
    %5 = arith.extf %4 : vector<128x128xbf16> to vector<128x128xf32>
    %c0_4 = arith.constant 0 : index
    %c0_5 = arith.constant 0 : index
    %6 = vector.load %arg3[%c0_4, %c0_5] : memref<128x16xf32, #tpu.memory_space<vmem>>, vector<128x16xf32>
    %cst = arith.constant dense<0.000000e+00> : vector<128x16xf32>
    %7 = tpu.matmul %5, %6, %cst {dimension_numbers = #tpu.dot_dimension_numbers<[1], [0], [0], [1], [0, 0, 1, 1], [], []>} : vector<128x128xf32>, vector<128x16xf32>, vector<128x16xf32> -> vector<128x16xf32>
    %8 = arith.addf %3, %7 : vector<128x16xf32>
    %c0_6 = arith.constant 0 : index
    %c0_7 = arith.constant 0 : index
    %9 = vector.load %arg9[%c0_6, %c0_7] : memref<128x16xf32, #tpu.memory_space<vmem>>, vector<128x16xf32>
    tpu.vector_store %arg9[%c0_6, %c0_7], %8 {strides = array<i32>} : memref<128x16xf32, #tpu.memory_space<vmem>>, vector<128x16xf32>,
    %c2_i32 = arith.constant 2 : i32
    %10 = arith.cmpi eq, %arg1, %c2_i32 : i32
    %11 = arith.extui %10 : i1 to i32
    %c0_i32_8 = arith.constant 0 : i32
    %12 = arith.cmpi ne, %11, %c0_i32_8 : i32
    scf.if %12 {
      %c0_9 = arith.constant 0 : index
      %c0_10 = arith.constant 0 : index
      %13 = vector.load %arg9[%c0_9, %c0_10] : memref<128x16xf32, #tpu.memory_space<vmem>>, vector<128x16xf32>
      %c0_11 = arith.constant 0 : index
      %c0_12 = arith.constant 0 : index
      %14 = vector.load %arg4[%c0_11, %c0_12] : memref<128x16xf32, #tpu.memory_space<vmem>>, vector<128x16xf32>
      %c0_13 = arith.constant 0 : index
      %c0_14 = arith.constant 0 : index
      %15 = vector.load %arg5[%c0_13, %c0_14] : memref<16x128xf32, #tpu.memory_space<vmem>>, vector<16x128xf32>
      %cst_15 = arith.constant dense<0.000000e+00> : vector<128x128xf32>
      %16 = tpu.matmul %13, %15, %cst_15 {dimension_numbers = #tpu.dot_dimension_numbers<[1], [0], [0], [1], [0, 0, 1, 1], [], []>} : vector<128x16xf32>, vector<16x128xf32>, vector<128x128xf32> -> vector<128x128xf32>
      %c0_16 = arith.constant 0 : index
      %c0_17 = arith.constant 0 : index
      %17 = vector.load %arg6[%c0_16, %c0_17] : memref<16x128xf32, #tpu.memory_space<vmem>>, vector<16x128xf32>
      %cst_18 = arith.constant dense<0.000000e+00> : vector<128x128xf32>
      %18 = tpu.matmul %14, %17, %cst_18 {dimension_numbers = #tpu.dot_dimension_numbers<[1], [0], [0], [1], [0, 0, 1, 1], [], []>} : vector<128x16xf32>, vector<16x128xf32>, vector<128x128xf32> -> vector<128x128xf32>
      %19 = arith.addf %16, %18 : vector<128x128xf32>
      %c0_19 = arith.constant 0 : index
      %c0_20 = arith.constant 0 : index
      %20 = vector.load %arg7[%c0_19, %c0_20] : memref<1x128xf32, #tpu.memory_space<vmem>>, vector<1x128xf32>
      %21 = vector.broadcast %20 : vector<1x128xf32> to vector<128x128xf32>
      %22 = arith.addf %19, %21 : vector<128x128xf32>
      %cst_21 = arith.constant 0.000000e+00 : f32
      %23 = vector.broadcast %cst_21 : f32 to vector<128x128xf32>
      %24 = arith.maximumf %22, %23 : vector<128x128xf32>
      %c0_22 = arith.constant 0 : index
      %c0_23 = arith.constant 0 : index
      %25 = vector.load %arg8[%c0_22, %c0_23] : memref<128x128xf32, #tpu.memory_space<vmem>>, vector<128x128xf32>
      tpu.vector_store %arg8[%c0_22, %c0_23], %24 {strides = array<i32>} : memref<128x128xf32, #tpu.memory_space<vmem>>, vector<128x128xf32>,
    } else {
    }
    return
  }
  func.func @transform_0(%arg0: i32, %arg1: i32) -> (i32, i32) {
    %c0_i32 = arith.constant 0 : i32
    return %arg0, %arg1 : i32, i32
  }
  func.func @transform_1(%arg0: i32, %arg1: i32) -> (i32, i32) {
    %c0_i32 = arith.constant 0 : i32
    %c0_i32_0 = arith.constant 0 : i32
    return %arg1, %c0_i32 : i32, i32
  }
  func.func @transform_2(%arg0: i32, %arg1: i32) -> (i32, i32) {
    %c0_i32 = arith.constant 0 : i32
    %c0_i32_0 = arith.constant 0 : i32
    return %arg0, %c0_i32 : i32, i32
  }
  func.func @transform_3(%arg0: i32, %arg1: i32) -> (i32, i32) {
    %c0_i32 = arith.constant 0 : i32
    %c0_i32_0 = arith.constant 0 : i32
    %c0_i32_1 = arith.constant 0 : i32
    return %c0_i32, %c0_i32_0 : i32, i32
  }
  func.func @transform_4(%arg0: i32, %arg1: i32) -> (i32, i32) {
    %c0_i32 = arith.constant 0 : i32
    %c0_i32_0 = arith.constant 0 : i32
    %c0_i32_1 = arith.constant 0 : i32
    return %c0_i32, %c0_i32_0 : i32, i32
  }
  func.func @transform_5(%arg0: i32, %arg1: i32) -> (i32, i32) {
    %c0_i32 = arith.constant 0 : i32
    %c0_i32_0 = arith.constant 0 : i32
    %c0_i32_1 = arith.constant 0 : i32
    return %c0_i32, %c0_i32_0 : i32, i32
  }
  func.func @transform_6(%arg0: i32, %arg1: i32) -> (i32, i32) {
    %c0_i32 = arith.constant 0 : i32
    %c0_i32_0 = arith.constant 0 : i32
    return %arg0, %c0_i32 : i32, i32
  }
}

module attributes {stable_mosaic.version = 11 : i64} {
  func.func @_sage_kernel(%arg0: i32, %arg1: i32, %arg2: memref<128x128xbf16, #tpu.memory_space<vmem>>, %arg3: memref<128x32xf32, #tpu.memory_space<vmem>>, %arg4: memref<128x32xf32, #tpu.memory_space<vmem>>, %arg5: memref<32x128xf32, #tpu.memory_space<vmem>>, %arg6: memref<32x128xf32, #tpu.memory_space<vmem>>, %arg7: memref<1x128xf32, #tpu.memory_space<vmem>>, %arg8: memref<128x128xf32, #tpu.memory_space<vmem>>, %arg9: memref<128x32xf32, #tpu.memory_space<vmem>>) attributes {dimension_semantics = [#tpu.dimension_semantics<parallel>, #tpu.dimension_semantics<arbitrary>], iteration_bounds = array<i64: 3, 3>, scalar_prefetch = 0 : i64, scratch_operands = 1 : i64, tpu.core_type = #tpu.core_type<tc>, window_params = [{transform_indices = @transform_0, window_bounds = array<i64: 128, 128>}, {transform_indices = @transform_1, window_bounds = array<i64: 128, 32>}, {transform_indices = @transform_2, window_bounds = array<i64: 128, 32>}, {pipeline_mode = #tpu.pipeline_mode<synchronous>, transform_indices = @transform_3, window_bounds = array<i64: 32, 128>}, {pipeline_mode = #tpu.pipeline_mode<synchronous>, transform_indices = @transform_4, window_bounds = array<i64: 32, 128>}, {pipeline_mode = #tpu.pipeline_mode<synchronous>, transform_indices = @transform_5, window_bounds = array<i64: 1, 128>}, {transform_indices = @transform_6, window_bounds = array<i64: 128, 128>}]} {
    %c0_i32 = arith.constant 0 : i32
    %0 = arith.cmpi eq, %arg1, %c0_i32 : i32
    %1 = arith.extui %0 : i1 to i32
    %c0_i32_0 = arith.constant 0 : i32
    %2 = arith.cmpi ne, %1, %c0_i32_0 : i32
    scf.if %2 {
      %cst_9 = arith.constant 0.000000e+00 : f32
      %13 = vector.broadcast %cst_9 : f32 to vector<128x32xf32>
      %c0_10 = arith.constant 0 : index
      %c0_11 = arith.constant 0 : index
      %14 = vector.load %arg9[%c0_10, %c0_11] : memref<128x32xf32, #tpu.memory_space<vmem>>, vector<128x32xf32>
      tpu.vector_store %arg9[%c0_10, %c0_11], %13 {strides = array<i32>} : memref<128x32xf32, #tpu.memory_space<vmem>>, vector<128x32xf32>,
    } else {
    }
    %c0 = arith.constant 0 : index
    %c0_1 = arith.constant 0 : index
    %3 = vector.load %arg9[%c0, %c0_1] : memref<128x32xf32, #tpu.memory_space<vmem>>, vector<128x32xf32>
    %c0_2 = arith.constant 0 : index
    %c0_3 = arith.constant 0 : index
    %4 = vector.load %arg2[%c0_2, %c0_3] : memref<128x128xbf16, #tpu.memory_space<vmem>>, vector<128x128xbf16>
    %5 = arith.extf %4 : vector<128x128xbf16> to vector<128x128xf32>
    %c0_4 = arith.constant 0 : index
    %c0_5 = arith.constant 0 : index
    %6 = vector.load %arg3[%c0_4, %c0_5] : memref<128x32xf32, #tpu.memory_space<vmem>>, vector<128x32xf32>
    %cst = arith.constant dense<0.000000e+00> : vector<128x32xf32>
    %7 = tpu.matmul %5, %6, %cst {dimension_numbers = #tpu.dot_dimension_numbers<[1], [0], [0], [1], [0, 0, 1, 1], [], []>} : vector<128x128xf32>, vector<128x32xf32>, vector<128x32xf32> -> vector<128x32xf32>
    %8 = arith.addf %3, %7 : vector<128x32xf32>
    %c0_6 = arith.constant 0 : index
    %c0_7 = arith.constant 0 : index
    %9 = vector.load %arg9[%c0_6, %c0_7] : memref<128x32xf32, #tpu.memory_space<vmem>>, vector<128x32xf32>
    tpu.vector_store %arg9[%c0_6, %c0_7], %8 {strides = array<i32>} : memref<128x32xf32, #tpu.memory_space<vmem>>, vector<128x32xf32>,
    %c2_i32 = arith.constant 2 : i32
    %10 = arith.cmpi eq, %arg1, %c2_i32 : i32
    %11 = arith.extui %10 : i1 to i32
    %c0_i32_8 = arith.constant 0 : i32
    %12 = arith.cmpi ne, %11, %c0_i32_8 : i32
    scf.if %12 {
      %c0_9 = arith.constant 0 : index
      %c0_10 = arith.constant 0 : index
      %13 = vector.load %arg9[%c0_9, %c0_10] : memref<128x32xf32, #tpu.memory_space<vmem>>, vector<128x32xf32>
      %c0_11 = arith.constant 0 : index
      %c0_12 = arith.constant 0 : index
      %14 = vector.load %arg4[%c0_11, %c0_12] : memref<128x32xf32, #tpu.memory_space<vmem>>, vector<128x32xf32>
      %c0_13 = arith.constant 0 : index
      %c0_14 = arith.constant 0 : index
      %15 = vector.load %arg5[%c0_13, %c0_14] : memref<32x128xf32, #tpu.memory_space<vmem>>, vector<32x128xf32>
      %cst_15 = arith.constant dense<0.000000e+00> : vector<128x128xf32>
      %16 = tpu.matmul %13, %15, %cst_15 {dimension_numbers = #tpu.dot_dimension_numbers<[1], [0], [0], [1], [0, 0, 1, 1], [], []>} : vector<128x32xf32>, vector<32x128xf32>, vector<128x128xf32> -> vector<128x128xf32>
      %c0_16 = arith.constant 0 : index
      %c0_17 = arith.constant 0 : index
      %17 = vector.load %arg6[%c0_16, %c0_17] : memref<32x128xf32, #tpu.memory_space<vmem>>, vector<32x128xf32>
      %cst_18 = arith.constant dense<0.000000e+00> : vector<128x128xf32>
      %18 = tpu.matmul %14, %17, %cst_18 {dimension_numbers = #tpu.dot_dimension_numbers<[1], [0], [0], [1], [0, 0, 1, 1], [], []>} : vector<128x32xf32>, vector<32x128xf32>, vector<128x128xf32> -> vector<128x128xf32>
      %19 = arith.addf %16, %18 : vector<128x128xf32>
      %c0_19 = arith.constant 0 : index
      %c0_20 = arith.constant 0 : index
      %20 = vector.load %arg7[%c0_19, %c0_20] : memref<1x128xf32, #tpu.memory_space<vmem>>, vector<1x128xf32>
      %21 = vector.broadcast %20 : vector<1x128xf32> to vector<128x128xf32>
      %22 = arith.addf %19, %21 : vector<128x128xf32>
      %23 = tpu.iota {dimensions = array<i32: 1>} : vector<128x128xi32>
      %c8_i32 = arith.constant 8 : i32
      %24 = vector.broadcast %c8_i32 : i32 to vector<128x128xi32>
      %25 = arith.cmpi slt, %23, %24 : vector<128x128xi32>
      %cst_21 = arith.constant -1.000000e+30 : f32
      %26 = vector.broadcast %cst_21 : f32 to vector<128x128xf32>
      %27 = arith.select %25, %22, %26 : vector<128x128xi1>, vector<128x128xf32>
      %cst_22 = arith.constant dense<0xFF800000> : vector<128xf32>
      %28 = vector.multi_reduction <maximumf>, %27, %cst_22 [1] : vector<128x128xf32> to vector<128xf32>
      %29 = vector.shape_cast %28 : vector<128xf32> to vector<128x1xf32>
      %30 = vector.broadcast %29 : vector<128x1xf32> to vector<128x128xf32>
      %31 = arith.subf %27, %30 : vector<128x128xf32>
      %32 = math.exp %31 : vector<128x128xf32>
      %cst_23 = arith.constant dense<0.000000e+00> : vector<128xf32>
      %33 = vector.multi_reduction <add>, %32, %cst_23 [1] : vector<128x128xf32> to vector<128xf32>
      %34 = vector.shape_cast %33 : vector<128xf32> to vector<128x1xf32>
      %35 = math.log %34 : vector<128x1xf32>
      %36 = arith.addf %35, %29 : vector<128x1xf32>
      %37 = vector.broadcast %36 : vector<128x1xf32> to vector<128x128xf32>
      %38 = arith.subf %27, %37 : vector<128x128xf32>
      %c0_24 = arith.constant 0 : index
      %c0_25 = arith.constant 0 : index
      %39 = vector.load %arg8[%c0_24, %c0_25] : memref<128x128xf32, #tpu.memory_space<vmem>>, vector<128x128xf32>
      tpu.vector_store %arg8[%c0_24, %c0_25], %38 {strides = array<i32>} : memref<128x128xf32, #tpu.memory_space<vmem>>, vector<128x128xf32>,
    } else {
    }
    return
  }
  func.func @transform_0(%arg0: i32, %arg1: i32) -> (i32, i32) {
    %c0_i32 = arith.constant 0 : i32
    return %arg0, %arg1 : i32, i32
  }
  func.func @transform_1(%arg0: i32, %arg1: i32) -> (i32, i32) {
    %c0_i32 = arith.constant 0 : i32
    %c0_i32_0 = arith.constant 0 : i32
    return %arg1, %c0_i32 : i32, i32
  }
  func.func @transform_2(%arg0: i32, %arg1: i32) -> (i32, i32) {
    %c0_i32 = arith.constant 0 : i32
    %c0_i32_0 = arith.constant 0 : i32
    return %arg0, %c0_i32 : i32, i32
  }
  func.func @transform_3(%arg0: i32, %arg1: i32) -> (i32, i32) {
    %c0_i32 = arith.constant 0 : i32
    %c0_i32_0 = arith.constant 0 : i32
    %c0_i32_1 = arith.constant 0 : i32
    return %c0_i32, %c0_i32_0 : i32, i32
  }
  func.func @transform_4(%arg0: i32, %arg1: i32) -> (i32, i32) {
    %c0_i32 = arith.constant 0 : i32
    %c0_i32_0 = arith.constant 0 : i32
    %c0_i32_1 = arith.constant 0 : i32
    return %c0_i32, %c0_i32_0 : i32, i32
  }
  func.func @transform_5(%arg0: i32, %arg1: i32) -> (i32, i32) {
    %c0_i32 = arith.constant 0 : i32
    %c0_i32_0 = arith.constant 0 : i32
    %c0_i32_1 = arith.constant 0 : i32
    return %c0_i32, %c0_i32_0 : i32, i32
  }
  func.func @transform_6(%arg0: i32, %arg1: i32) -> (i32, i32) {
    %c0_i32 = arith.constant 0 : i32
    %c0_i32_0 = arith.constant 0 : i32
    return %arg0, %c0_i32 : i32, i32
  }
}

</mosaic_0001>

<bundles_post_ra>
// kernel: net_forward.3
= control target key start
LH: loop header
LB: loop body
LE: loop exit
PB: predicated region body
PF: predicated region fallthrough
CT: control target
= control target key end

     0   :  { %s1975_s21 = smov 0   ;;  %s1977_s22 = smov 0   ;;  %s2442_s0 = inlined_call_operand.vmem [shape: bf16[384,384], index: 0, kind: input, shape index: {}]   ;;  %s2443_s1 = inlined_call_operand.vmem [shape: f32[384,32], index: 1, kind: input, shape index: {}, may-alias: {1,2}]   ;;  %s2444_s2 = inlined_call_operand.vmem [shape: f32[384,32], index: 2, kind: input, shape index: {}, may-alias: {1,2}]   ;;  %s2445_s3 = inlined_call_operand.vmem [shape: f32[32,128], index: 3, kind: input, shape index: {}]   ;;  %s2446_s4 = inlined_call_operand.vmem [shape: f32[32,128], index: 4, kind: input, shape index: {}]   ;;  %s2447_s5 = inlined_call_operand.vmem [shape: f32[1,128], index: 5, kind: input, shape index: {}]   ;;  %s2448_s6 = inlined_call_operand.vmem [shape: f32[384,128], index: 6, kind: output, shape index: {}]  }
   0x1   :  { %s1979_s23 = smov 0   ;;  %s1981_s24 = smov 0  }
   0x2   :  { %s1983_s25 = smov 0   ;;  %s1985_s26 = smov 0  }
   0x3   :  { %s1987_s27 = smov 0  }
   0x4 LB: > { %s25_s28 = sadd.s32 1, %s1929_s25  ;;  %s28_s29 = sadd.s32 1, %s1933_s26  ;;  %s1937_s27 = sphi %s1987_s27, %s16_s27   ;;  %s1933_s26 = sphi %s1985_s26, %s2454_s26   ;;  %s1929_s25 = sphi %s1983_s25, %s2453_s25   ;;  %s1925_s24 = sphi %s1981_s24, %s2452_s24   ;;  %s1921_s23 = sphi %s1979_s23, %s2451_s23   ;;  %s1917_s22 = sphi %s1977_s22, %s2450_s22   ;;  %s1913_s21 = sphi %s1975_s21, %s2449_s21  }
   0x5   : > { %p26_p0 = scmp.ge.s32.totalorder %s25_s28, 3  ;;  %p44_p1 = scmp.ne.s32.totalorder %s1917_s22, %s1913_s21 }
   0x6   : > { %p45_p2 = scmp.eq.s32.totalorder %s1937_s27, 0  ;;  %s37_s9 = sadd.s32 1, %s1917_s22 }
   0x7   : > { %s2456_s28 = smov (%p26_p0, %s25_s28), 0  ;;  %s2458_s29 = smov (!%p26_p0, %s28_s29), %s1933_s26 }
   0x8   : > { %p46_p3 = por %p45_p2, %p44_p1  ;;  %p30_p4 = scmp.ge.s32.totalorder %s2458_s29, 3 }
   0x9   : > { %s33_s30 = ssub.s32 %s1929_s25, %s2456_s28  ;;  %p1448_p6 = scmp.ge.s32.totalorder %s1937_s27, 9 }
   0xa   : > { %s2460_s29 = smov (%p30_p4, %s2458_s29), 0 }
   0xb   : > { %s32_s7 = ssub.s32 %s1933_s26, %s2460_s29  ;;  %220 = sbr.rel (%p1448_p6) target bundleno = 33 (0x21), region = 28 }
   0xc   : > { %s34_s8 = sor.u32 %s33_s30, %s32_s7 }
   0xd   : > { %p35_p5 = scmp.eq.s32.totalorder %s34_s8, 0 }
   0xf   : > { %s2026_s10 = scalar_select %p35_p5, %s1917_s22, %s37_s9  }
  0x10   : > { %223 = sbr.rel (!%p46_p3) target bundleno = 33 (0x21), region = 32  ;;  %s225_s11 = sand.u32 (%p46_p3), 1, %s1917_s22  }
  0x11   : > { %s1761_s12 = smul.u32 (%p46_p3), 48, %s1933_s26  ;;  %s1449_s13 = sshll.u32 (%p46_p3), %s225_s11, 6 }
  0x12   : > { %s227_s19 = scalar_lea.vmem (%p46_p3), [#allocation3], %s1449_s13 }
  0x13   : > { %s230_s14 = sadd.s32 (%p46_p3), %s1929_s25, %s1761_s12 }
  0x14   : > { %s1452_s15 = sshll.u32 (%p46_p3), %s230_s14, 2 }
  0x15   : > { %s2035_s18 = scalar_lea.vmem %s2442_s0, %s1452_s15 }
  0x16   : > { %v249_v0 = vld [vmem:[%s2035_s18] sm:$0xf]  ;;  %v251_v1 = vld [vmem:[%s2035_s18 + $0xc] sm:$0xf]  ;;  %v253_v2 = vld [vmem:[%s2035_s18 + $0x18] sm:$0xf] }
  0x17   : > { %250 = vst [vmem:[%s227_s19] sm:$0xf] %v249_v0  ;;  %252 = vst [vmem:[%s227_s19 + $0x4] sm:$0xf] %v251_v1  ;;  %v255_v3 = vld [vmem:[%s2035_s18 + $0x24] sm:$0xf] }
  0x18   : > { %254 = vst [vmem:[%s227_s19 + $0x8] sm:$0xf] %v253_v2  ;;  %v257_v4 = vld [vmem:[%s2035_s18 + $0x30] sm:$0xf]  ;;  %v259_v5 = vld [vmem:[%s2035_s18 + $0x3c] sm:$0xf] }
  0x19   : > { %256 = vst [vmem:[%s227_s19 + $0xc] sm:$0xf] %v255_v3  ;;  %258 = vst [vmem:[%s227_s19 + $0x10] sm:$0xf] %v257_v4  ;;  %v261_v6 = vld [vmem:[%s2035_s18 + $0x48] sm:$0xf] }
  0x1a   : > { %260 = vst [vmem:[%s227_s19 + $0x14] sm:$0xf] %v259_v5  ;;  %v263_v7 = vld [vmem:[%s2035_s18 + $0x54] sm:$0xf]  ;;  %v265_v8 = vld [vmem:[%s2035_s18 + $0x60] sm:$0xf] }
  0x1b   : > { %262 = vst [vmem:[%s227_s19 + $0x18] sm:$0xf] %v261_v6  ;;  %264 = vst [vmem:[%s227_s19 + $0x1c] sm:$0xf] %v263_v7  ;;  %v267_v9 = vld [vmem:[%s2035_s18 + $0x6c] sm:$0xf] }
  0x1c   : > { %266 = vst [vmem:[%s227_s19 + $0x20] sm:$0xf] %v265_v8  ;;  %v269_v10 = vld [vmem:[%s2035_s18 + $0x78] sm:$0xf]  ;;  %v271_v11 = vld [vmem:[%s2035_s18 + $0x84] sm:$0xf] }
  0x1d   : > { %268 = vst [vmem:[%s227_s19 + $0x24] sm:$0xf] %v267_v9  ;;  %270 = vst [vmem:[%s227_s19 + $0x28] sm:$0xf] %v269_v10  ;;  %v273_v12 = vld [vmem:[%s2035_s18 + $0x90] sm:$0xf] }
  0x1e   : > { %272 = vst [vmem:[%s227_s19 + $0x2c] sm:$0xf] %v271_v11  ;;  %v275_v13 = vld [vmem:[%s2035_s18 + $0x9c] sm:$0xf]  ;;  %v277_v14 = vld [vmem:[%s2035_s18 + $0xa8] sm:$0xf] }
  0x1f   : > { %274 = vst [vmem:[%s227_s19 + $0x30] sm:$0xf] %v273_v12  ;;  %276 = vst [vmem:[%s227_s19 + $0x34] sm:$0xf] %v275_v13  ;;  %v279_v15 = vld [vmem:[%s2035_s18 + $0xb4] sm:$0xf] }
  0x20   : > { %278 = vst [vmem:[%s227_s19 + $0x38] sm:$0xf] %v277_v14  ;;  %280 = vst [vmem:[%s227_s19 + $0x3c] sm:$0xf] %v279_v15 }
  0x21 PF: > { %p1453_p7 = scmp.ge.s32.totalorder %s1937_s27, 1  ;;  %p353_p8 = scmp.lt.s32.totalorder %s1937_s27, 10 }
  0x23   : > { %p354_p9 = pnand %p1453_p7, %p353_p8 }
  0x24   : > { %s360_s20 = sand.u32 (!%p354_p9), 1, %s1913_s21   ;;  %s1455_s30 = sshll.u32 (!%p354_p9), %s1921_s23, 4 }
  0x25   : > { %357 = sbr.rel (%p354_p9) target bundleno = 860 (0x35c), region = 81  ;;  %s1454_s7 = sshll.u32 (!%p354_p9), %s360_s20, 6 }
  0x26   : > { %p401_p10 = scmp.lt.s32.totalorder (!%p354_p9), %s1455_s30, 47  ;;  %s1457_s8 = sshll.u32 (!%p354_p9), %s1925_s24, 4 }
  0x27   : > { %p407_p11 = scmp.lt.s32.totalorder (!%p354_p9), %s1457_s8, 47  ;;  %s2073_s24 = scalar_lea.vmem (!%p354_p9), [#allocation3], %s1454_s7 }
  0x28   : > { %p1461_p12 = scmp.ne.s32.totalorder (!%p354_p9), %s1921_s23, 0 }
  0x2a   : > { %s2462_s30 = smov (!%p401_p10, %s1455_s30), 47  ;;  %s2464_s8 = smov (!%p407_p11, %s1457_s8), 47 }
  0x2b   : > { %s1456_s9 = sshll.u32 %s2462_s30, 3  ;;  %s1458_s14 = sshll.u32 %s2464_s8, 3 }
  0x2c   : > { %s2061_s13 = scalar_lea.vmem %s2443_s1, %s1456_s9  ;;  %s2066_s17 = scalar_lea.vmem %s2444_s2, %s1458_s14 }
  0x2d   : > { %s2071_s19 = scalar_lea.vmem %s2448_s6, %s1458_s14  ;;  %421 = sbr.rel (%p1461_p12) target bundleno = 59 (0x3b), region = 89 }
  0x32   : > { %vm422_vm0 = vcmask 261120   ;;  %v1939_v16 = vmov 0.0  }
  0x33   : > { %423 = vst.msk [vmem:[#allocation2] sm:$0xff] %vm422_vm0, %v1939_v16  ;;  %424 = vst.msk [vmem:[#allocation2 + $0x8] sm:$0xff] %vm422_vm0, %v1939_v16 }
  0x34   : > { %425 = vst.msk [vmem:[#allocation2 + $0x10] sm:$0xff] %vm422_vm0, %v1939_v16  ;;  %426 = vst.msk [vmem:[#allocation2 + $0x18] sm:$0xff] %vm422_vm0, %v1939_v16 }
  0x35   : > { %427 = vst.msk [vmem:[#allocation2 + $0x20] sm:$0xff] %vm422_vm0, %v1939_v16  ;;  %428 = vst.msk [vmem:[#allocation2 + $0x28] sm:$0xff] %vm422_vm0, %v1939_v16 }
  0x36   : > { %429 = vst.msk [vmem:[#allocation2 + $0x30] sm:$0xff] %vm422_vm0, %v1939_v16  ;;  %430 = vst.msk [vmem:[#allocation2 + $0x38] sm:$0xff] %vm422_vm0, %v1939_v16 }
  0x37   : > { %431 = vst.msk [vmem:[#allocation2 + $0x40] sm:$0xff] %vm422_vm0, %v1939_v16  ;;  %432 = vst.msk [vmem:[#allocation2 + $0x48] sm:$0xff] %vm422_vm0, %v1939_v16 }
  0x38   : > { %433 = vst.msk [vmem:[#allocation2 + $0x50] sm:$0xff] %vm422_vm0, %v1939_v16  ;;  %434 = vst.msk [vmem:[#allocation2 + $0x58] sm:$0xff] %vm422_vm0, %v1939_v16 }
  0x39   : > { %435 = vst.msk [vmem:[#allocation2 + $0x60] sm:$0xff] %vm422_vm0, %v1939_v16  ;;  %436 = vst.msk [vmem:[#allocation2 + $0x68] sm:$0xff] %vm422_vm0, %v1939_v16 }
  0x3a   : > { %437 = vst.msk [vmem:[#allocation2 + $0x70] sm:$0xff] %vm422_vm0, %v1939_v16  ;;  %438 = vst.msk [vmem:[#allocation2 + $0x78] sm:$0xff] %vm422_vm0, %v1939_v16 }
  0x3b PF: > { %v502_v17 = vld [vmem:[%s2061_s13 + $0x78] sm:$0xff]  ;;  %v501_v18 = vld [vmem:[%s2061_s13 + $0x70] sm:$0xff]  ;;  %v500_v19 = vld [vmem:[%s2061_s13 + $0x68] sm:$0xff]  ;;  %vm664_vm1 = vcmask 261120   ;;  %p1462_p13 = scmp.ne.s32.totalorder %s1921_s23, 2 }
  0x3c   : > { %1609 = vmatprep.subr.mxu0 %v502_v17  ;;  %1729 = vmatprep.subr.mxu1 %v502_v17  ;;  %v499_v20 = vld [vmem:[%s2061_s13 + $0x60] sm:$0xff]  ;;  %v498_v21 = vld [vmem:[%s2061_s13 + $0x58] sm:$0xff]  ;;  %v497_v22 = vld [vmem:[%s2061_s13 + $0x50] sm:$0xff] }
  0x3d   : > { %1610 = vmatpush3.msra.mxu0 %v502_v17  ;;  %1745 = vmatpush3.msra.mxu1 %v502_v17  ;;  %v496_v23 = vld [vmem:[%s2061_s13 + $0x48] sm:$0xff]  ;;  %v495_v24 = vld [vmem:[%s2061_s13 + $0x40] sm:$0xff]  ;;  %v494_v25 = vld [vmem:[%s2061_s13 + $0x38] sm:$0xff] }
  0x3e   : > { %1611 = vmatprep.subr.mxu0 %v501_v18  ;;  %1730 = vmatprep.subr.mxu1 %v501_v18  ;;  %v493_v26 = vld [vmem:[%s2061_s13 + $0x30] sm:$0xff]  ;;  %v492_v27 = vld [vmem:[%s2061_s13 + $0x28] sm:$0xff]  ;;  %v491_v28 = vld [vmem:[%s2061_s13 + $0x20] sm:$0xff] }
  0x3f   : > { %1612 = vmatpush3.msra.mxu0 %v501_v18  ;;  %1746 = vmatpush3.msra.mxu1 %v501_v18  ;;  %v490_v29 = vld [vmem:[%s2061_s13 + $0x18] sm:$0xff]  ;;  %v489_v30 = vld [vmem:[%s2061_s13 + $0x10] sm:$0xff]  ;;  %v488_v31 = vld [vmem:[%s2061_s13 + $0x8] sm:$0xff] }
  0x40   : > { %1613 = vmatprep.subr.mxu0 %v500_v19  ;;  %1731 = vmatprep.subr.mxu1 %v500_v19  ;;  %v1499_v32 = vld [vmem:[%s2073_s24] sm:$0xff]   ;;  %v1530_v35 = vld [vmem:[%s2073_s24 + $0x8] sm:$0xff]   ;;  %v1531_v43 = vld [vmem:[%s2073_s24 + $0x10] sm:$0xff]  }
  0x41   : > { %1614 = vmatpush3.msra.mxu0 %v500_v19  ;;  %1747 = vmatpush3.msra.mxu1 %v500_v19  ;;  %v1533_v33 = vld [vmem:[%s2073_s24 + $0x20] sm:$0xff]   ;;  %v1534_v36 = vld [vmem:[%s2073_s24 + $0x28] sm:$0xff]   ;;  %v1500_v37 = vunpack.c.l.bf16 %v1499_v32  ;;  %v1501_v39 = vunpack.c.h.bf16 %v1499_v32  ;;  %v1504_v41 = vunpack.c.l.bf16 %v1530_v35  ;;  %v1535_v44 = vld [vmem:[%s2073_s24 + $0x30] sm:$0xff]   ;;  %v1505_v45 = vunpack.c.h.bf16 %v1530_v35 }
  0x42   : > { %1615 = vmatprep.subr.mxu0 %v499_v20  ;;  %1732 = vmatprep.subr.mxu1 %v499_v20  ;;  %v487_v34 = vld [vmem:[%s2061_s13] sm:$0xff]  ;;  %v1516_v38 = vunpack.c.l.bf16 %v1533_v33  ;;  %v1517_v40 = vunpack.c.h.bf16 %v1533_v33  ;;  %v1520_v42 = vunpack.c.l.bf16 %v1534_v36  ;;  %v1521_v46 = vunpack.c.h.bf16 %v1534_v36  ;;  %v1532_v49 = vld [vmem:[%s2073_s24 + $0x18] sm:$0xff]   ;;  %v440_v57 = vld [vmem:[#allocation2 + $0x8] sm:$0xff] }
  0x43   : > { %1616 = vmatpush3.msra.mxu0 %v499_v20  ;;  %1748 = vmatpush3.msra.mxu1 %v499_v20  ;;  %v1508_v47 = vunpack.c.l.bf16 %v1531_v43  ;;  %v1524_v48 = vunpack.c.l.bf16 %v1535_v44  ;;  %v1536_v50 = vld [vmem:[%s2073_s24 + $0x38] sm:$0xff]   ;;  %v1509_v51 = vunpack.c.h.bf16 %v1531_v43  ;;  %v1525_v52 = vunpack.c.h.bf16 %v1535_v44  ;;  %v448_v58 = vld [vmem:[#allocation2 + $0x48] sm:$0xff]  ;;  %v439_v61 = vld [vmem:[#allocation2] sm:$0xff] }
  0x44   : > { %1617 = vmatprep.subr.mxu0 %v498_v21  ;;  %1733 = vmatprep.subr.mxu1 %v498_v21  ;;  %v1512_v53 = vunpack.c.l.bf16 %v1532_v49  ;;  %v1528_v54 = vunpack.c.l.bf16 %v1536_v50  ;;  %v1513_v55 = vunpack.c.h.bf16 %v1532_v49  ;;  %v1529_v56 = vunpack.c.h.bf16 %v1536_v50  ;;  %v447_v62 = vld [vmem:[#allocation2 + $0x40] sm:$0xff]  ;;  %v442_v3 = vld [vmem:[#allocation2 + $0x18] sm:$0xff]  ;;  %v441_v9 = vld [vmem:[#allocation2 + $0x10] sm:$0xff] }
  0x45   : > { %1618 = vmatpush3.msra.mxu0 %v498_v21  ;;  %1749 = vmatpush3.msra.mxu1 %v498_v21  ;;  %v450_v4 = vld [vmem:[#allocation2 + $0x58] sm:$0xff]  ;;  %v449_v10 = vld [vmem:[#allocation2 + $0x50] sm:$0xff]  ;;  %v444_v15 = vld [vmem:[#allocation2 + $0x28] sm:$0xff] }
  0x46   : > { %1619 = vmatprep.subr.mxu0 %v497_v22  ;;  %1734 = vmatprep.subr.mxu1 %v497_v22  ;;  %v452_v16 = vld [vmem:[#allocation2 + $0x68] sm:$0xff]  ;;  %v443_v21 = vld [vmem:[#allocation2 + $0x20] sm:$0xff]  ;;  %v445_v33 = vld [vmem:[#allocation2 + $0x30] sm:$0xff] }
  0x47   : > { %1620 = vmatpush3.msra.mxu0 %v497_v22  ;;  %1750 = vmatpush3.msra.mxu1 %v497_v22  ;;  %v451_v22 = vld [vmem:[#allocation2 + $0x60] sm:$0xff] }
  0x48   : > { %1621 = vmatprep.subr.mxu0 %v496_v23  ;;  %1735 = vmatprep.subr.mxu1 %v496_v23 }
  0x49   : > { %1622 = vmatpush3.msra.mxu0 %v496_v23  ;;  %1751 = vmatpush3.msra.mxu1 %v496_v23 }
  0x4a   : > { %1623 = vmatprep.subr.mxu0 %v495_v24  ;;  %1736 = vmatprep.subr.mxu1 %v495_v24 }
  0x4b   : > { %1624 = vmatpush3.msra.mxu0 %v495_v24  ;;  %1752 = vmatpush3.msra.mxu1 %v495_v24 }
  0x4c   : > { %1625 = vmatprep.subr.mxu0 %v494_v25  ;;  %1737 = vmatprep.subr.mxu1 %v494_v25 }
  0x4d   : > { %1626 = vmatpush3.msra.mxu0 %v494_v25  ;;  %1753 = vmatpush3.msra.mxu1 %v494_v25 }
  0x4e   : > { %1627 = vmatprep.subr.mxu0 %v493_v26  ;;  %1738 = vmatprep.subr.mxu1 %v493_v26 }
  0x4f   : > { %1628 = vmatpush3.msra.mxu0 %v493_v26  ;;  %1754 = vmatpush3.msra.mxu1 %v493_v26 }
  0x50   : > { %1629 = vmatprep.subr.mxu0 %v492_v27  ;;  %1739 = vmatprep.subr.mxu1 %v492_v27 }
  0x51   : > { %1630 = vmatpush3.msra.mxu0 %v492_v27  ;;  %1755 = vmatpush3.msra.mxu1 %v492_v27  ;;  %v446_v27 = vld [vmem:[#allocation2 + $0x38] sm:$0xff] }
  0x52   : > { %1631 = vmatprep.subr.mxu0 %v491_v28  ;;  %1740 = vmatprep.subr.mxu1 %v491_v28 }
  0x53   : > { %1632 = vmatpush3.msra.mxu0 %v491_v28  ;;  %1756 = vmatpush3.msra.mxu1 %v491_v28  ;;  %v454_v28 = vld [vmem:[#allocation2 + $0x78] sm:$0xff] }
  0x54   : > { %1633 = vmatprep.subr.mxu0 %v490_v29  ;;  %1741 = vmatprep.subr.mxu1 %v490_v29 }
  0x55   : > { %1634 = vmatpush3.msra.mxu0 %v490_v29  ;;  %1757 = vmatpush3.msra.mxu1 %v490_v29 }
  0x56   : > { %1635 = vmatprep.subr.mxu0 %v489_v30  ;;  %1742 = vmatprep.subr.mxu1 %v489_v30 }
  0x57   : > { %1636 = vmatpush3.msra.mxu0 %v489_v30  ;;  %1758 = vmatpush3.msra.mxu1 %v489_v30 }
  0x58   : > { %1637 = vmatprep.subr.mxu0 %v488_v31  ;;  %1743 = vmatprep.subr.mxu1 %v488_v31 }
  0x59   : > { %1638 = vmatpush3.msra.mxu0 %v488_v31  ;;  %1759 = vmatpush3.msra.mxu1 %v488_v31 }
  0x5a   : > { %1639 = vmatprep.subr.mxu0 %v487_v34  ;;  %1744 = vmatprep.subr.mxu1 %v487_v34 }
  0x5b   : > { %1640 = vmatpush3.msra.mxu0 %v487_v34  ;;  %1760 = vmatpush3.msra.mxu1 %v487_v34  ;;  %v453_v34 = vld [vmem:[#allocation2 + $0x70] sm:$0xff] }
  0x5c   : > { %1641 = vmatprep.mubr.f32.mxu0 %v1500_v37  ;;  %1653 = vmatprep.mubr.f32.mxu1 %v1516_v38 }
  0x5d   : > { %1642 = vmatmul.mubr.f32.vlgmr.msra.gmra.mxu0 %v1501_v39  ;;  %1654 = vmatmul.mubr.f32.vlgmr.msra.gmra.mxu1 %v1517_v40 }
  0x5e   : > { %1644 = vmatprep.mubr.f32.mxu0 %v1504_v41  ;;  %1656 = vmatprep.mubr.f32.mxu1 %v1520_v42 }
  0x61   : > { %1645 = vmatmul.mubr.f32.gmra.mxu0 %v1505_v45  ;;  %1657 = vmatmul.mubr.f32.gmra.mxu1 %v1521_v46 }
  0x62   : > { %1647 = vmatprep.mubr.f32.mxu0 %v1508_v47  ;;  %1659 = vmatprep.mubr.f32.mxu1 %v1524_v48 }
  0x65   : > { %1648 = vmatmul.mubr.f32.gmra.mxu0 %v1509_v51  ;;  %1660 = vmatmul.mubr.f32.gmra.mxu1 %v1525_v52 }
  0x66   : > { %1650 = vmatprep.mubr.f32.mxu0 %v1512_v53  ;;  %1662 = vmatprep.mubr.f32.mxu1 %v1528_v54 }
  0x69   : > { %1651 = vmatmul.mubr.f32.gmra.mxu0 %v1513_v55  ;;  %1663 = vmatmul.mubr.f32.gmra.mxu1 %v1529_v56 }
 0x11d   : > { %v1643_v59 = vpop.f32.mrf.mxu0  ;;  %v1655_v60 = vpop.f32.mrf.mxu1 }
 0x11e   : > { %v649_v63 = vadd.f32 %v1643_v59, %v440_v57  ;;  %v657_v0 = vadd.f32 %v1655_v60, %v448_v58 }
 0x11f   : > { %v569_v1 = vpop.f32.mrf.mxu0  ;;  %v609_v2 = vpop.f32.mrf.mxu1 }
 0x120   : > { %666 = vst.msk [vmem:[#allocation2 + $0x8] sm:$0xff] %vm664_vm1, %v649_v63  ;;  %674 = vst.msk [vmem:[#allocation2 + $0x48] sm:$0xff] %vm664_vm1, %v657_v0  ;;  %v648_v5 = vadd.f32 %v569_v1, %v439_v61  ;;  %v656_v6 = vadd.f32 %v609_v2, %v447_v62 }
 0x121   : > { %v1646_v7 = vpop.f32.mrf.mxu0  ;;  %v1658_v8 = vpop.f32.mrf.mxu1 }
 0x122   : > { %665 = vst.msk [vmem:[#allocation2] sm:$0xff] %vm664_vm1, %v648_v5  ;;  %673 = vst.msk [vmem:[#allocation2 + $0x40] sm:$0xff] %vm664_vm1, %v656_v6  ;;  %v651_v11 = vadd.f32 %v1646_v7, %v442_v3  ;;  %v659_v12 = vadd.f32 %v1658_v8, %v450_v4 }
 0x123   : > { %v579_v13 = vpop.f32.mrf.mxu0  ;;  %v619_v14 = vpop.f32.mrf.mxu1 }
 0x124   : > { %668 = vst.msk [vmem:[#allocation2 + $0x18] sm:$0xff] %vm664_vm1, %v651_v11  ;;  %676 = vst.msk [vmem:[#allocation2 + $0x58] sm:$0xff] %vm664_vm1, %v659_v12  ;;  %v650_v17 = vadd.f32 %v579_v13, %v441_v9  ;;  %v658_v18 = vadd.f32 %v619_v14, %v449_v10 }
 0x125   : > { %v1649_v19 = vpop.f32.mrf.mxu0  ;;  %v1661_v20 = vpop.f32.mrf.mxu1 }
 0x126   : > { %667 = vst.msk [vmem:[#allocation2 + $0x10] sm:$0xff] %vm664_vm1, %v650_v17  ;;  %675 = vst.msk [vmem:[#allocation2 + $0x50] sm:$0xff] %vm664_vm1, %v658_v18  ;;  %v653_v23 = vadd.f32 %v1649_v19, %v444_v15  ;;  %v661_v24 = vadd.f32 %v1661_v20, %v452_v16 }
 0x127   : > { %v589_v25 = vpop.f32.mrf.mxu0  ;;  %v629_v26 = vpop.f32.mrf.mxu1 }
 0x128   : > { %670 = vst.msk [vmem:[#allocation2 + $0x28] sm:$0xff] %vm664_vm1, %v653_v23  ;;  %678 = vst.msk [vmem:[#allocation2 + $0x68] sm:$0xff] %vm664_vm1, %v661_v24  ;;  %v652_v29 = vadd.f32 %v589_v25, %v443_v21  ;;  %v660_v30 = vadd.f32 %v629_v26, %v451_v22 }
 0x129   : > { %v1652_v31 = vpop.f32.mrf.mxu0  ;;  %v1664_v32 = vpop.f32.mrf.mxu1 }
 0x12a   : > { %669 = vst.msk [vmem:[#allocation2 + $0x20] sm:$0xff] %vm664_vm1, %v652_v29  ;;  %677 = vst.msk [vmem:[#allocation2 + $0x60] sm:$0xff] %vm664_vm1, %v660_v30  ;;  %v655_v35 = vadd.f32 %v1652_v31, %v446_v27  ;;  %v663_v36 = vadd.f32 %v1664_v32, %v454_v28  ;;  %684 = sbr.rel (%p1462_p13) target bundleno = 860 (0x35c), region = 93 }
 0x12b   : > { %v599_v37 = vpop.f32.mrf.mxu0  ;;  %v639_v38 = vpop.f32.mrf.mxu1 }
 0x12c   : > { %672 = vst.msk [vmem:[#allocation2 + $0x38] sm:$0xff] %vm664_vm1, %v655_v35  ;;  %680 = vst.msk [vmem:[#allocation2 + $0x78] sm:$0xff] %vm664_vm1, %v663_v36  ;;  %v654_v39 = vadd.f32 %v599_v37, %v445_v33  ;;  %v662_v40 = vadd.f32 %v639_v38, %v453_v34 }
 0x12e   : > { %671 = vst.msk [vmem:[#allocation2 + $0x30] sm:$0xff] %vm664_vm1, %v654_v39  ;;  %679 = vst.msk [vmem:[#allocation2 + $0x70] sm:$0xff] %vm664_vm1, %v662_v40 }
 0x12f   : > { %v724_v41 = vld [vmem:[%s2446_s4 + $0x18] sm:$0xff]  ;;  %v723_v43 = vld [vmem:[%s2446_s4 + $0x10] sm:$0xff]  ;;  %v722_v45 = vld [vmem:[%s2446_s4 + $0x8] sm:$0xff]  ;;  %v1134_v17 = vlaneseq }
 0x130   : > { %v720_v42 = vld [vmem:[%s2445_s3 + $0x18] sm:$0xff]  ;;  %1665 = vmatprep.subr.mxu0 %v724_v41  ;;  %v719_v44 = vld [vmem:[%s2445_s3 + $0x10] sm:$0xff]  ;;  %v718_v46 = vld [vmem:[%s2445_s3 + $0x8] sm:$0xff] }
 0x131   : > { %1697 = vmatprep.subr.mxu1 %v720_v42  ;;  %1666 = vmatpush3.msra.mxu0 %v724_v41  ;;  %v721_v47 = vld [vmem:[%s2446_s4] sm:$0xff]  ;;  %v702_v51 = vld [vmem:[%s2066_s17 + $0x8] sm:$0xff]  ;;  %v703_v53 = vld [vmem:[%s2066_s17 + $0x10] sm:$0xff]  ;;  %v2205_v18 = vand.u32 127, %v1134_v17 }
 0x132   : > { %1698 = vmatpush3.msra.mxu1 %v720_v42  ;;  %1667 = vmatprep.subr.mxu0 %v723_v43  ;;  %v717_v48 = vld [vmem:[%s2445_s3] sm:$0xff]  ;;  %v686_v52 = vld [vmem:[#allocation2 + $0x8] sm:$0xff]  ;;  %v687_v54 = vld [vmem:[#allocation2 + $0x10] sm:$0xff] }
 0x133   : > { %1699 = vmatprep.subr.mxu1 %v719_v44  ;;  %1668 = vmatpush3.msra.mxu0 %v723_v43  ;;  %v701_v49 = vld [vmem:[%s2066_s17] sm:$0xff]  ;;  %v704_v55 = vld [vmem:[%s2066_s17 + $0x18] sm:$0xff]  ;;  %v706_v59 = vld [vmem:[%s2066_s17 + $0x28] sm:$0xff]  ;;  %vm1136_vm2 = vcmp.lt.s32.totalorder %v2205_v18, 8 }
 0x134   : > { %1700 = vmatpush3.msra.mxu1 %v719_v44  ;;  %1669 = vmatprep.subr.mxu0 %v722_v45  ;;  %v685_v50 = vld [vmem:[#allocation2] sm:$0xff]  ;;  %v688_v56 = vld [vmem:[#allocation2 + $0x18] sm:$0xff]  ;;  %v690_v60 = vld [vmem:[#allocation2 + $0x28] sm:$0xff] }
 0x135   : > { %1701 = vmatprep.subr.mxu1 %v718_v46  ;;  %1670 = vmatpush3.msra.mxu0 %v722_v45  ;;  %v705_v57 = vld [vmem:[%s2066_s17 + $0x20] sm:$0xff]  ;;  %v707_v61 = vld [vmem:[%s2066_s17 + $0x30] sm:$0xff]  ;;  %v708_v63 = vld [vmem:[%s2066_s17 + $0x38] sm:$0xff] }
 0x136   : > { %1702 = vmatpush3.msra.mxu1 %v718_v46  ;;  %1671 = vmatprep.subr.mxu0 %v721_v47  ;;  %v689_v58 = vld [vmem:[#allocation2 + $0x20] sm:$0xff]  ;;  %v691_v62 = vld [vmem:[#allocation2 + $0x30] sm:$0xff]  ;;  %v692_v0 = vld [vmem:[#allocation2 + $0x38] sm:$0xff] }
 0x137   : > { %1703 = vmatprep.subr.mxu1 %v717_v48  ;;  %1672 = vmatpush3.msra.mxu0 %v721_v47  ;;  %v709_v1 = vld [vmem:[%s2066_s17 + $0x40] sm:$0xff]  ;;  %v710_v3 = vld [vmem:[%s2066_s17 + $0x48] sm:$0xff]  ;;  %v711_v5 = vld [vmem:[%s2066_s17 + $0x50] sm:$0xff] }
 0x138   : > { %1673 = vmatprep.mubr.msk.f32.mxu0 %vm664_vm1, %v701_v49  ;;  %1704 = vmatpush3.msra.mxu1 %v717_v48  ;;  %v693_v2 = vld [vmem:[#allocation2 + $0x40] sm:$0xff]  ;;  %v694_v4 = vld [vmem:[#allocation2 + $0x48] sm:$0xff]  ;;  %v695_v6 = vld [vmem:[#allocation2 + $0x50] sm:$0xff] }
 0x139   : > { %1705 = vmatprep.mubr.msk.f32.mxu1 %vm664_vm1, %v685_v50  ;;  %1674 = vmatmul.mubr.msk.f32.vlgmr.msra.gmra.mxu0 %vm664_vm1, %v702_v51  ;;  %v712_v7 = vld [vmem:[%s2066_s17 + $0x58] sm:$0xff]  ;;  %v713_v9 = vld [vmem:[%s2066_s17 + $0x60] sm:$0xff]  ;;  %v714_v11 = vld [vmem:[%s2066_s17 + $0x68] sm:$0xff] }
 0x13a   : > { %1706 = vmatmul.mubr.msk.f32.vlgmr.msra.gmra.mxu1 %vm664_vm1, %v686_v52  ;;  %1676 = vmatprep.mubr.msk.f32.mxu0 %vm664_vm1, %v703_v53  ;;  %v696_v8 = vld [vmem:[#allocation2 + $0x58] sm:$0xff]  ;;  %v697_v10 = vld [vmem:[#allocation2 + $0x60] sm:$0xff]  ;;  %v698_v12 = vld [vmem:[#allocation2 + $0x68] sm:$0xff] }
 0x13b   : > { %1708 = vmatprep.mubr.msk.f32.mxu1 %vm664_vm1, %v687_v54  ;;  %v715_v13 = vld [vmem:[%s2066_s17 + $0x70] sm:$0xff]  ;;  %v716_v15 = vld [vmem:[%s2066_s17 + $0x78] sm:$0xff]  ;;  %v2210_v21 = vld [vmem:[%s2447_s5] ss:$0 sm:$0xff] }
 0x13c   : > { %v699_v14 = vld [vmem:[#allocation2 + $0x70] sm:$0xff]  ;;  %v700_v16 = vld [vmem:[#allocation2 + $0x78] sm:$0xff] }
 0x13d   : > { %1677 = vmatmul.mubr.msk.f32.gmra.mxu0 %vm664_vm1, %v704_v55 }
 0x13e   : > { %1709 = vmatmul.mubr.msk.f32.gmra.mxu1 %vm664_vm1, %v688_v56  ;;  %1679 = vmatprep.mubr.msk.f32.mxu0 %vm664_vm1, %v705_v57 }
 0x13f   : > { %1711 = vmatprep.mubr.msk.f32.mxu1 %vm664_vm1, %v689_v58 }
 0x141   : > { %1680 = vmatmul.mubr.msk.f32.gmra.mxu0 %vm664_vm1, %v706_v59 }
 0x142   : > { %1712 = vmatmul.mubr.msk.f32.gmra.mxu1 %vm664_vm1, %v690_v60  ;;  %1682 = vmatprep.mubr.msk.f32.mxu0 %vm664_vm1, %v707_v61 }
 0x143   : > { %1714 = vmatprep.mubr.msk.f32.mxu1 %vm664_vm1, %v691_v62 }
 0x145   : > { %1683 = vmatmul.mubr.msk.f32.gmra.mxu0 %vm664_vm1, %v708_v63 }
 0x146   : > { %1715 = vmatmul.mubr.msk.f32.gmra.mxu1 %vm664_vm1, %v692_v0  ;;  %1685 = vmatprep.mubr.msk.f32.mxu0 %vm664_vm1, %v709_v1 }
 0x147   : > { %1717 = vmatprep.mubr.msk.f32.mxu1 %vm664_vm1, %v693_v2 }
 0x149   : > { %1686 = vmatmul.mubr.msk.f32.gmra.mxu0 %vm664_vm1, %v710_v3 }
 0x14a   : > { %1718 = vmatmul.mubr.msk.f32.gmra.mxu1 %vm664_vm1, %v694_v4  ;;  %1688 = vmatprep.mubr.msk.f32.mxu0 %vm664_vm1, %v711_v5 }
 0x14b   : > { %1720 = vmatprep.mubr.msk.f32.mxu1 %vm664_vm1, %v695_v6 }
 0x14d   : > { %1689 = vmatmul.mubr.msk.f32.gmra.mxu0 %vm664_vm1, %v712_v7 }
 0x14e   : > { %1721 = vmatmul.mubr.msk.f32.gmra.mxu1 %vm664_vm1, %v696_v8  ;;  %1691 = vmatprep.mubr.msk.f32.mxu0 %vm664_vm1, %v713_v9 }
 0x14f   : > { %1723 = vmatprep.mubr.msk.f32.mxu1 %vm664_vm1, %v697_v10 }
 0x151   : > { %1692 = vmatmul.mubr.msk.f32.gmra.mxu0 %vm664_vm1, %v714_v11 }
 0x152   : > { %1724 = vmatmul.mubr.msk.f32.gmra.mxu1 %vm664_vm1, %v698_v12  ;;  %1694 = vmatprep.mubr.msk.f32.mxu0 %vm664_vm1, %v715_v13 }
 0x153   : > { %1726 = vmatprep.mubr.msk.f32.mxu1 %vm664_vm1, %v699_v14 }
 0x155   : > { %1695 = vmatmul.mubr.msk.f32.gmra.mxu0 %vm664_vm1, %v716_v15 }
 0x156   : > { %1727 = vmatmul.mubr.msk.f32.gmra.mxu1 %vm664_vm1, %v700_v16 }
 0x1f9   : > { %v1675_v19 = vpop.f32.mrf.mxu0 }
 0x1fa   : > { %v1707_v20 = vpop.f32.mrf.mxu1 }
 0x1fb   : > { %v1038_v22 = vadd.f32 %v1707_v20, %v1675_v19  ;;  %v839_v23 = vpop.f32.mrf.mxu0 }
 0x1fc   : > { %v1032_v24 = vpop.f32.mrf.mxu1 }
 0x1fd   : > { %v1119_v25 = vadd.f32 %v2210_v21, %v1038_v22  ;;  %v1033_v26 = vadd.f32 %v1032_v24, %v839_v23  ;;  %v1678_v27 = vpop.f32.mrf.mxu0 }
 0x1fe   : > { %v1710_v28 = vpop.f32.mrf.mxu1 }
 0x1ff   : > { %v1118_v29 = vadd.f32 %v2210_v21, %v1033_v26  ;;  %v1048_v30 = vadd.f32 %v1710_v28, %v1678_v27  ;;  %v2217_v31 = vsel %vm1136_vm2, %v1119_v25, -1e+30  ;;  %v849_v32 = vpop.f32.mrf.mxu0 }
 0x200   : > { %1155 = vmax.xlane.f32.xlu0 %v2217_v31  ;;  %v1042_v33 = vpop.f32.mrf.mxu1 }
 0x201   : > { %v1121_v34 = vadd.f32 %v2210_v21, %v1048_v30  ;;  %v1043_v35 = vadd.f32 %v1042_v33, %v849_v32  ;;  %v1681_v36 = vpop.f32.mrf.mxu0  ;;  %v2228_v41 = vsel %vm1136_vm2, %v1118_v29, -1e+30 }
 0x202   : > { %v1713_v37 = vpop.f32.mrf.mxu1 }
 0x203   : > { %v1120_v38 = vadd.f32 %v2210_v21, %v1043_v35  ;;  %v1058_v39 = vadd.f32 %v1713_v37, %v1681_v36  ;;  %v2224_v40 = vsel %vm1136_vm2, %v1121_v34, -1e+30  ;;  %v859_v42 = vpop.f32.mrf.mxu0 }
 0x204   : > { %1159 = vmax.xlane.f32.xlu1 %v2224_v40  ;;  %v1052_v43 = vpop.f32.mrf.mxu1  ;;  %1153 = vmax.xlane.f32.xlu0 %v2228_v41 }
 0x205   : > { %v1053_v44 = vadd.f32 %v1052_v43, %v859_v42  ;;  %v1684_v45 = vpop.f32.mrf.mxu0  ;;  %v1123_v47 = vadd.f32 %v2210_v21, %v1058_v39  ;;  %v2236_v50 = vsel %vm1136_vm2, %v1120_v38, -1e+30 }
 0x206   : > { %v1716_v46 = vpop.f32.mrf.mxu1 }
 0x207   : > { %v1122_v48 = vadd.f32 %v2210_v21, %v1053_v44  ;;  %v1068_v49 = vadd.f32 %v1716_v46, %v1684_v45  ;;  %v869_v51 = vpop.f32.mrf.mxu0  ;;  %v2248_v60 = vsel %vm1136_vm2, %v1123_v47, -1e+30 }
 0x208   : > { %v1062_v52 = vpop.f32.mrf.mxu1  ;;  %1157 = vmax.xlane.f32.xlu1 %v2236_v50 }
 0x209   : > { %v1063_v53 = vadd.f32 %v1062_v52, %v869_v51  ;;  %v2241_v54 = vsel %vm1136_vm2, %v1122_v48, -1e+30  ;;  %v1687_v55 = vpop.f32.mrf.mxu0  ;;  %v1125_v57 = vadd.f32 %v2210_v21, %v1068_v49 }
 0x20a   : > { %v1719_v56 = vpop.f32.mrf.mxu1  ;;  %1161 = vmax.xlane.f32.xlu0 %v2241_v54 }
 0x20b   : > { %v1124_v58 = vadd.f32 %v2210_v21, %v1063_v53  ;;  %v1078_v59 = vadd.f32 %v1719_v56, %v1687_v55  ;;  %v879_v61 = vpop.f32.mrf.mxu0  ;;  %v2260_v6 = vsel %vm1136_vm2, %v1125_v57, -1e+30 }
 0x20c   : > { %v1072_v62 = vpop.f32.mrf.mxu1  ;;  %1163 = vmax.xlane.f32.xlu1 %v2248_v60 }
 0x20d   : > { %v1073_v63 = vadd.f32 %v1072_v62, %v879_v61  ;;  %v2253_v0 = vsel %vm1136_vm2, %v1124_v58, -1e+30  ;;  %v1690_v1 = vpop.f32.mrf.mxu0  ;;  %v1127_v3 = vadd.f32 %v2210_v21, %v1078_v59 }
 0x20e   : > { %v1722_v2 = vpop.f32.mrf.mxu1  ;;  %1165 = vmax.xlane.f32.xlu0 %v2253_v0 }
 0x20f   : > { %v1126_v4 = vadd.f32 %v2210_v21, %v1073_v63  ;;  %v1088_v5 = vadd.f32 %v1722_v2, %v1690_v1  ;;  %v889_v7 = vpop.f32.mrf.mxu0  ;;  %v2272_v16 = vsel %vm1136_vm2, %v1127_v3, -1e+30 }
 0x210   : > { %v1082_v8 = vpop.f32.mrf.mxu1  ;;  %1167 = vmax.xlane.f32.xlu1 %v2260_v6 }
 0x211   : > { %v1083_v9 = vadd.f32 %v1082_v8, %v889_v7  ;;  %v2265_v10 = vsel %vm1136_vm2, %v1126_v4, -1e+30  ;;  %v1693_v11 = vpop.f32.mrf.mxu0  ;;  %v1129_v13 = vadd.f32 %v2210_v21, %v1088_v5 }
 0x212   : > { %v1725_v12 = vpop.f32.mrf.mxu1  ;;  %1169 = vmax.xlane.f32.xlu0 %v2265_v10 }
 0x213   : > { %v1128_v14 = vadd.f32 %v2210_v21, %v1083_v9  ;;  %v1098_v15 = vadd.f32 %v1725_v12, %v1693_v11  ;;  %v899_v17 = vpop.f32.mrf.mxu0  ;;  %v2284_v28 = vsel %vm1136_vm2, %v1129_v13, -1e+30 }
 0x214   : > { %v1092_v19 = vpop.f32.mrf.mxu1  ;;  %1171 = vmax.xlane.f32.xlu1 %v2272_v16 }
 0x215   : > { %v1093_v20 = vadd.f32 %v1092_v19, %v899_v17  ;;  %v2277_v22 = vsel %vm1136_vm2, %v1128_v14, -1e+30  ;;  %v1696_v23 = vpop.f32.mrf.mxu0  ;;  %v1131_v25 = vadd.f32 %v2210_v21, %v1098_v15 }
 0x216   : > { %v1728_v24 = vpop.f32.mrf.mxu1  ;;  %1173 = vmax.xlane.f32.xlu0 %v2277_v22 }
 0x217   : > { %v1130_v26 = vadd.f32 %v2210_v21, %v1093_v20  ;;  %v1108_v27 = vadd.f32 %v1728_v24, %v1696_v23  ;;  %v909_v29 = vpop.f32.mrf.mxu0  ;;  %v2296_v36 = vsel %vm1136_vm2, %v1131_v25, -1e+30 }
 0x218   : > { %v1102_v30 = vpop.f32.mrf.mxu1  ;;  %1175 = vmax.xlane.f32.xlu1 %v2284_v28 }
 0x219   : > { %v1103_v32 = vadd.f32 %v1102_v30, %v909_v29  ;;  %v2289_v33 = vsel %vm1136_vm2, %v1130_v26, -1e+30  ;;  %v1133_v34 = vadd.f32 %v2210_v21, %v1108_v27 }
 0x21a   : > { %1177 = vmax.xlane.f32.xlu0 %v2289_v33 }
 0x21b   : > { %v1132_v35 = vadd.f32 %v2210_v21, %v1103_v32  ;;  %v2306_v38 = vsel %vm1136_vm2, %v1133_v34, -1e+30 }
 0x21c   : > { %1179 = vmax.xlane.f32.xlu1 %v2296_v36 }
 0x21d   : > { %v2301_v37 = vsel %vm1136_vm2, %v1132_v35, -1e+30 }
 0x21e   : > { %1181 = vmax.xlane.f32.xlu0 %v2301_v37 }
 0x220   : > { %1183 = vmax.xlane.f32.xlu1 %v2306_v38 }
 0x289   : > { %v2309_v39 = vpop.xlane.xlu0 %1155 }
 0x28a   : > { %v1186_v21 = vsub.f32 %v2217_v31, %v2309_v39 }
 0x28c   : > { %v1203_v42 = vmul.f32 1.442695, %v1186_v21 }
 0x28d   : > { %v2313_v43 = vpop.xlane.xlu1 %1159  ;;  %v2315_v44 = vpop.xlane.xlu0 %1153 }
 0x28e   : > { %1819 = vpow2.f32 %v1203_v42  ;;  %v1188_v45 = vsub.f32 %v2224_v40, %v2313_v43  ;;  %v1185_v18 = vsub.f32 %v2228_v41, %v2315_v44 }
 0x290   : > { %v1207_v46 = vmul.f32 1.442695, %v1188_v45  ;;  %v1201_v47 = vmul.f32 1.442695, %v1185_v18 }
 0x291   : > { %v2321_v48 = vpop.xlane.xlu1 %1157 }
 0x292   : > { %1821 = vpow2.f32 %v1207_v46  ;;  %v1187_v49 = vsub.f32 %v2236_v50, %v2321_v48 }
 0x293   : > { %1823 = vpow2.f32 %v1201_v47  ;;  %v2325_v51 = vpop.xlane.xlu0 %1161 }
 0x294   : > { %v1205_v52 = vmul.f32 1.442695, %v1187_v49  ;;  %v1189_v53 = vsub.f32 %v2241_v54, %v2325_v51 }
 0x295   : > { %v2329_v55 = vpop.xlane.xlu1 %1163 }
 0x296   : > { %1825 = vpow2.f32 %v1205_v52  ;;  %v1190_v56 = vsub.f32 %v2248_v60, %v2329_v55  ;;  %v1209_v57 = vmul.f32 1.442695, %v1189_v53 }
 0x297   : > { %v2333_v58 = vpop.xlane.xlu0 %1165 }
 0x298   : > { %v1211_v59 = vmul.f32 1.442695, %v1190_v56  ;;  %v1191_v61 = vsub.f32 %v2253_v0, %v2333_v58 }
 0x299   : > { %v2337_v62 = vpop.xlane.xlu1 %1167 }
 0x29a   : > { %1827 = vpow2.f32 %v1211_v59  ;;  %v1192_v63 = vsub.f32 %v2260_v6, %v2337_v62  ;;  %v1213_v2 = vmul.f32 1.442695, %v1191_v61 }
 0x29b   : > { %v1820_v1 = vpop.eup %1819  ;;  %1829 = vpow2.f32 %v1209_v57  ;;  %v2341_v3 = vpop.xlane.xlu0 %1169 }
 0x29c   : > { %v1215_v4 = vmul.f32 1.442695, %v1192_v63  ;;  %v1193_v5 = vsub.f32 %v2265_v10, %v2341_v3  ;;  %1235 = vadd.xlane.f32.xlu1 %v1820_v1 }
 0x29d   : > { %v2345_v7 = vpop.xlane.xlu1 %1171 }
 0x29e   : > { %1831 = vpow2.f32 %v1215_v4  ;;  %v1194_v8 = vsub.f32 %v2272_v16, %v2345_v7  ;;  %v1217_v11 = vmul.f32 1.442695, %v1193_v5 }
 0x29f   : > { %v1822_v9 = vpop.eup %1821  ;;  %1833 = vpow2.f32 %v1213_v2  ;;  %v2349_v12 = vpop.xlane.xlu0 %1173 }
 0x2a0   : > { %v1824_v13 = vpop.eup %1823  ;;  %v1219_v14 = vmul.f32 1.442695, %v1194_v8  ;;  %v1195_v15 = vsub.f32 %v2277_v22, %v2349_v12  ;;  %1239 = vadd.xlane.f32.xlu1 %v1822_v9 }
 0x2a1   : > { %1233 = vadd.xlane.f32.xlu0 %v1824_v13  ;;  %v2353_v17 = vpop.xlane.xlu1 %1175 }
 0x2a2   : > { %1835 = vpow2.f32 %v1219_v14  ;;  %v1196_v19 = vsub.f32 %v2284_v28, %v2353_v17  ;;  %v1221_v23 = vmul.f32 1.442695, %v1195_v15 }
 0x2a3   : > { %v1826_v20 = vpop.eup %1825  ;;  %1837 = vpow2.f32 %v1217_v11  ;;  %v2357_v24 = vpop.xlane.xlu0 %1177 }
 0x2a4   : > { %v1223_v25 = vmul.f32 1.442695, %v1196_v19  ;;  %v1197_v26 = vsub.f32 %v2289_v33, %v2357_v24 }
 0x2a5   : > { %1237 = vadd.xlane.f32.xlu0 %v1826_v20  ;;  %v2361_v27 = vpop.xlane.xlu1 %1179 }
 0x2a6   : > { %1839 = vpow2.f32 %v1223_v25  ;;  %v1198_v29 = vsub.f32 %v2296_v36, %v2361_v27  ;;  %v1225_v32 = vmul.f32 1.442695, %v1197_v26 }
 0x2a7   : > { %v1828_v30 = vpop.eup %1827  ;;  %1841 = vpow2.f32 %v1221_v23  ;;  %v2365_v34 = vpop.xlane.xlu0 %1181 }
 0x2a8   : > { %v1830_v35 = vpop.eup %1829  ;;  %v1227_v21 = vmul.f32 1.442695, %v1198_v29  ;;  %v1199_v42 = vsub.f32 %v2301_v37, %v2365_v34  ;;  %1243 = vadd.xlane.f32.xlu1 %v1828_v30 }
 0x2a9   : > { %1241 = vadd.xlane.f32.xlu0 %v1830_v35  ;;  %v2369_v45 = vpop.xlane.xlu1 %1183 }
 0x2aa   : > { %1843 = vpow2.f32 %v1227_v21  ;;  %v1200_v18 = vsub.f32 %v2306_v38, %v2369_v45  ;;  %v1229_v47 = vmul.f32 1.442695, %v1199_v42 }
 0x2ab   : > { %v1832_v46 = vpop.eup %1831  ;;  %1845 = vpow2.f32 %v1225_v32 }
 0x2ac   : > { %v1834_v49 = vpop.eup %1833  ;;  %v1231_v52 = vmul.f32 1.442695, %v1200_v18  ;;  %1247 = vadd.xlane.f32.xlu1 %v1832_v46 }
 0x2ad   : > { %1245 = vadd.xlane.f32.xlu0 %v1834_v49 }
 0x2ae   : > { %1847 = vpow2.f32 %v1231_v52 }
 0x2af   : > { %v1836_v53 = vpop.eup %1835  ;;  %1849 = vpow2.f32 %v1229_v47 }
 0x2b0   : > { %v1838_v56 = vpop.eup %1837  ;;  %1251 = vadd.xlane.f32.xlu1 %v1836_v53 }
 0x2b1   : > { %1249 = vadd.xlane.f32.xlu0 %v1838_v56 }
 0x2b3   : > { %v1840_v57 = vpop.eup %1839 }
 0x2b4   : > { %v1842_v59 = vpop.eup %1841  ;;  %1255 = vadd.xlane.f32.xlu1 %v1840_v57 }
 0x2b5   : > { %1253 = vadd.xlane.f32.xlu0 %v1842_v59 }
 0x2b7   : > { %v1844_v61 = vpop.eup %1843 }
 0x2b8   : > { %v1846_v63 = vpop.eup %1845  ;;  %1259 = vadd.xlane.f32.xlu1 %v1844_v61 }
 0x2b9   : > { %1257 = vadd.xlane.f32.xlu0 %v1846_v63 }
 0x2bb   : > { %v1848_v1 = vpop.eup %1847 }
 0x2bc   : > { %v1850_v2 = vpop.eup %1849  ;;  %1263 = vadd.xlane.f32.xlu1 %v1848_v1 }
 0x2bd   : > { %1261 = vadd.xlane.f32.xlu0 %v1850_v2 }
 0x325   : > { %v1236_v4 = vpop.xlane.xlu1 %1235 }
 0x326   : > { %1851 = vlog2.f32 %v1236_v4 }
 0x329   : > { %v1240_v5 = vpop.xlane.xlu1 %1239 }
 0x32a   : > { %1853 = vlog2.f32 %v1240_v5  ;;  %v1234_v8 = vpop.xlane.xlu0 %1233 }
 0x32b   : > { %1855 = vlog2.f32 %v1234_v8 }
 0x32e   : > { %v1238_v9 = vpop.xlane.xlu0 %1237 }
 0x32f   : > { %1857 = vlog2.f32 %v1238_v9 }
 0x331   : > { %v1244_v11 = vpop.xlane.xlu1 %1243 }
 0x332   : > { %1859 = vlog2.f32 %v1244_v11  ;;  %v1242_v13 = vpop.xlane.xlu0 %1241 }
 0x333   : > { %v1852_v14 = vpop.eup %1851  ;;  %1861 = vlog2.f32 %v1242_v13 }
 0x334   : > { %v1268_v15 = vmul.f32 0.6931472, %v1852_v14 }
 0x335   : > { %v1248_v19 = vpop.xlane.xlu1 %1247 }
 0x336   : > { %v1298_v20 = vadd.f32 %v1268_v15, %v2309_v39  ;;  %1863 = vlog2.f32 %v1248_v19  ;;  %v1246_v23 = vpop.xlane.xlu0 %1245 }
 0x337   : > { %v1854_v25 = vpop.eup %1853  ;;  %1865 = vlog2.f32 %v1246_v23 }
 0x338   : > { %v1856_v26 = vpop.eup %1855  ;;  %v1314_v29 = vsub.f32 %v2217_v31, %v1298_v20  ;;  %v1272_v30 = vmul.f32 0.6931472, %v1854_v25 }
 0x339   : > { %v1266_v32 = vmul.f32 0.6931472, %v1856_v26  ;;  %v1252_v35 = vpop.xlane.xlu1 %1251 }
 0x33a   : > { %1330 = vst [vmem:[%s2071_s19 + $0x8] sm:$0xff] %v1314_v29  ;;  %v1300_v21 = vadd.f32 %v1272_v30, %v2313_v43  ;;  %1867 = vlog2.f32 %v1252_v35  ;;  %v1250_v42 = vpop.xlane.xlu0 %1249 }
 0x33b   : > { %v1297_v18 = vadd.f32 %v1266_v32, %v2315_v44  ;;  %1869 = vlog2.f32 %v1250_v42 }
 0x33c   : > { %v1858_v39 = vpop.eup %1857  ;;  %v1316_v46 = vsub.f32 %v2224_v40, %v1300_v21 }
 0x33d   : > { %v1313_v47 = vsub.f32 %v2228_v41, %v1297_v18  ;;  %v1270_v49 = vmul.f32 0.6931472, %v1858_v39  ;;  %v1256_v52 = vpop.xlane.xlu1 %1255 }
 0x33e   : > { %1332 = vst [vmem:[%s2071_s19 + $0x18] sm:$0xff] %v1316_v46  ;;  %1871 = vlog2.f32 %v1256_v52  ;;  %v1254_v31 = vpop.xlane.xlu0 %1253 }
 0x33f   : > { %v1860_v53 = vpop.eup %1859  ;;  %1329 = vst [vmem:[%s2071_s19] sm:$0xff] %v1313_v47  ;;  %v1299_v43 = vadd.f32 %v1270_v49, %v2321_v48  ;;  %1873 = vlog2.f32 %v1254_v31 }
 0x340   : > { %v1862_v56 = vpop.eup %1861  ;;  %v1276_v57 = vmul.f32 0.6931472, %v1860_v53 }
 0x341   : > { %v1315_v44 = vsub.f32 %v2236_v50, %v1299_v43  ;;  %v1274_v59 = vmul.f32 0.6931472, %v1862_v56  ;;  %v1260_v40 = vpop.xlane.xlu1 %1259 }
 0x342   : > { %v1302_v41 = vadd.f32 %v1276_v57, %v2329_v55  ;;  %1875 = vlog2.f32 %v1260_v40  ;;  %v1258_v61 = vpop.xlane.xlu0 %1257 }
 0x343   : > { %v1864_v63 = vpop.eup %1863  ;;  %1331 = vst [vmem:[%s2071_s19 + $0x10] sm:$0xff] %v1315_v44  ;;  %v1301_v1 = vadd.f32 %v1274_v59, %v2325_v51  ;;  %1877 = vlog2.f32 %v1258_v61 }
 0x344   : > { %v1866_v2 = vpop.eup %1865  ;;  %v1318_v48 = vsub.f32 %v2248_v60, %v1302_v41  ;;  %v1280_v4 = vmul.f32 0.6931472, %v1864_v63 }
 0x345   : > { %v1317_v5 = vsub.f32 %v2241_v54, %v1301_v1  ;;  %v1278_v50 = vmul.f32 0.6931472, %v1866_v2  ;;  %v1264_v8 = vpop.xlane.xlu1 %1263 }
 0x346   : > { %1334 = vst [vmem:[%s2071_s19 + $0x28] sm:$0xff] %v1318_v48  ;;  %v1304_v55 = vadd.f32 %v1280_v4, %v2337_v62  ;;  %1879 = vlog2.f32 %v1264_v8  ;;  %v1262_v9 = vpop.xlane.xlu0 %1261 }
 0x347   : > { %v1868_v11 = vpop.eup %1867  ;;  %1333 = vst [vmem:[%s2071_s19 + $0x20] sm:$0xff] %v1317_v5  ;;  %v1303_v51 = vadd.f32 %v1278_v50, %v2333_v58  ;;  %1881 = vlog2.f32 %v1262_v9 }
 0x348   : > { %v1870_v13 = vpop.eup %1869  ;;  %v1320_v60 = vsub.f32 %v2260_v6, %v1304_v55  ;;  %v1284_v14 = vmul.f32 0.6931472, %v1868_v11 }
 0x349   : > { %v1319_v54 = vsub.f32 %v2253_v0, %v1303_v51  ;;  %v1282_v15 = vmul.f32 0.6931472, %v1870_v13 }
 0x34a   : > { %1336 = vst [vmem:[%s2071_s19 + $0x38] sm:$0xff] %v1320_v60  ;;  %v1306_v19 = vadd.f32 %v1284_v14, %v2345_v7 }
 0x34b   : > { %v1872_v62 = vpop.eup %1871  ;;  %1335 = vst [vmem:[%s2071_s19 + $0x30] sm:$0xff] %v1319_v54  ;;  %v1305_v20 = vadd.f32 %v1282_v15, %v2341_v3 }
 0x34c   : > { %v1874_v23 = vpop.eup %1873  ;;  %v1322_v58 = vsub.f32 %v2272_v16, %v1306_v19  ;;  %v1288_v25 = vmul.f32 0.6931472, %v1872_v62 }
 0x34d   : > { %v1321_v6 = vsub.f32 %v2265_v10, %v1305_v20  ;;  %v1286_v26 = vmul.f32 0.6931472, %v1874_v23 }
 0x34e   : > { %1338 = vst [vmem:[%s2071_s19 + $0x48] sm:$0xff] %v1322_v58  ;;  %v1308_v0 = vadd.f32 %v1288_v25, %v2353_v17 }
 0x34f   : > { %v1876_v29 = vpop.eup %1875  ;;  %1337 = vst [vmem:[%s2071_s19 + $0x40] sm:$0xff] %v1321_v6  ;;  %v1307_v7 = vadd.f32 %v1286_v26, %v2349_v12 }
 0x350   : > { %v1878_v30 = vpop.eup %1877  ;;  %v1324_v3 = vsub.f32 %v2284_v28, %v1308_v0  ;;  %v1292_v32 = vmul.f32 0.6931472, %v1876_v29 }
 0x351   : > { %v1323_v16 = vsub.f32 %v2277_v22, %v1307_v7  ;;  %v1290_v35 = vmul.f32 0.6931472, %v1878_v30 }
 0x352   : > { %1340 = vst [vmem:[%s2071_s19 + $0x58] sm:$0xff] %v1324_v3  ;;  %v1310_v10 = vadd.f32 %v1292_v32, %v2361_v27 }
 0x353   : > { %v1880_v21 = vpop.eup %1879  ;;  %1339 = vst [vmem:[%s2071_s19 + $0x50] sm:$0xff] %v1323_v16  ;;  %v1309_v17 = vadd.f32 %v1290_v35, %v2357_v24 }
 0x354   : > { %v1882_v42 = vpop.eup %1881  ;;  %v1326_v12 = vsub.f32 %v2296_v36, %v1310_v10  ;;  %v1296_v18 = vmul.f32 0.6931472, %v1880_v21 }
 0x355   : > { %v1325_v28 = vsub.f32 %v2289_v33, %v1309_v17  ;;  %v1294_v39 = vmul.f32 0.6931472, %v1882_v42 }
 0x356   : > { %1342 = vst [vmem:[%s2071_s19 + $0x68] sm:$0xff] %v1326_v12  ;;  %v1312_v22 = vadd.f32 %v1296_v18, %v2369_v45 }
 0x357   : > { %1341 = vst [vmem:[%s2071_s19 + $0x60] sm:$0xff] %v1325_v28  ;;  %v1311_v46 = vadd.f32 %v1294_v39, %v2365_v34 }
 0x358   : > { %v1328_v27 = vsub.f32 %v2306_v38, %v1312_v22 }
 0x359   : > { %v1327_v47 = vsub.f32 %v2301_v37, %v1311_v46 }
 0x35a   : > { %1344 = vst [vmem:[%s2071_s19 + $0x78] sm:$0xff] %v1328_v27 }
 0x35b   : > { %1343 = vst [vmem:[%s2071_s19 + $0x70] sm:$0xff] %v1327_v47 }
 0x35c PF: > { %s16_s27 = sadd.s32 1, %s1937_s27   ;;  %s2449_s21 = smov %s1917_s22 }
 0x35d   : > { %p13_p0 = scmp.ge.s32.totalorder %s16_s27, 11   ;;  %s2450_s22 = smov %s2026_s10 }
 0x35e   : > { %s2451_s23 = smov %s1929_s25  ;;  %s2452_s24 = smov %s1933_s26 }
 0x35f   : > { %s2453_s25 = smov %s2456_s28  ;;  %s2454_s26 = smov %s2460_s29 }
 0x360   :  { %15 = sbr.rel (!%p13_p0) target bundleno = 4 (0x4), region = 134 }

// kernel: net_forward.2
= control target key start
LH: loop header
LB: loop body
LE: loop exit
PB: predicated region body
PF: predicated region fallthrough
CT: control target
= control target key end

     0   :  { %s1716_s21 = smov 0   ;;  %s1718_s22 = smov 0   ;;  %s1992_s0 = inlined_call_operand.vmem [shape: bf16[384,384], index: 0, kind: input, shape index: {}]   ;;  %s1993_s1 = inlined_call_operand.vmem [shape: f32[384,16], index: 1, kind: input, shape index: {}, may-alias: {1,2}]   ;;  %s1994_s2 = inlined_call_operand.vmem [shape: f32[384,16], index: 2, kind: input, shape index: {}, may-alias: {1,2}]   ;;  %s1995_s3 = inlined_call_operand.vmem [shape: f32[16,128], index: 3, kind: input, shape index: {}]   ;;  %s1996_s4 = inlined_call_operand.vmem [shape: f32[16,128], index: 4, kind: input, shape index: {}]   ;;  %s1997_s5 = inlined_call_operand.vmem [shape: f32[1,128], index: 5, kind: input, shape index: {}]   ;;  %s1998_s6 = inlined_call_operand.vmem [shape: f32[384,128], index: 6, kind: output, shape index: {}]  }
   0x1   :  { %s1720_s23 = smov 0   ;;  %s1722_s24 = smov 0  }
   0x2   :  { %s1724_s25 = smov 0   ;;  %s1726_s26 = smov 0  }
   0x3   :  { %s1728_s27 = smov 0  }
   0x4 LB: > { %s25_s28 = sadd.s32 1, %s1670_s25  ;;  %s28_s29 = sadd.s32 1, %s1674_s26  ;;  %s1678_s27 = sphi %s1728_s27, %s16_s27   ;;  %s1674_s26 = sphi %s1726_s26, %s2004_s26   ;;  %s1670_s25 = sphi %s1724_s25, %s2003_s25   ;;  %s1666_s24 = sphi %s1722_s24, %s2002_s24   ;;  %s1662_s23 = sphi %s1720_s23, %s2001_s23   ;;  %s1658_s22 = sphi %s1718_s22, %s2000_s22   ;;  %s1654_s21 = sphi %s1716_s21, %s1999_s21  }
   0x5   : > { %p26_p0 = scmp.ge.s32.totalorder %s25_s28, 3  ;;  %p44_p1 = scmp.ne.s32.totalorder %s1658_s22, %s1654_s21 }
   0x6   : > { %p45_p2 = scmp.eq.s32.totalorder %s1678_s27, 0  ;;  %s37_s9 = sadd.s32 1, %s1658_s22 }
   0x7   : > { %s2006_s28 = smov (%p26_p0, %s25_s28), 0  ;;  %s2008_s29 = smov (!%p26_p0, %s28_s29), %s1674_s26 }
   0x8   : > { %p46_p3 = por %p45_p2, %p44_p1  ;;  %p30_p4 = scmp.ge.s32.totalorder %s2008_s29, 3 }
   0x9   : > { %s33_s30 = ssub.s32 %s1670_s25, %s2006_s28  ;;  %p1265_p6 = scmp.ge.s32.totalorder %s1678_s27, 9 }
   0xa   : > { %s2010_s29 = smov (%p30_p4, %s2008_s29), 0 }
   0xb   : > { %s32_s7 = ssub.s32 %s1674_s26, %s2010_s29  ;;  %220 = sbr.rel (%p1265_p6) target bundleno = 33 (0x21), region = 28 }
   0xc   : > { %s34_s8 = sor.u32 %s33_s30, %s32_s7 }
   0xd   : > { %p35_p5 = scmp.eq.s32.totalorder %s34_s8, 0 }
   0xf   : > { %s1767_s10 = scalar_select %p35_p5, %s1658_s22, %s37_s9  }
  0x10   : > { %223 = sbr.rel (!%p46_p3) target bundleno = 33 (0x21), region = 32  ;;  %s225_s11 = sand.u32 (%p46_p3), 1, %s1658_s22  }
  0x11   : > { %s1566_s12 = smul.u32 (%p46_p3), 48, %s1674_s26  ;;  %s1266_s13 = sshll.u32 (%p46_p3), %s225_s11, 6 }
  0x12   : > { %s227_s19 = scalar_lea.vmem (%p46_p3), [#allocation3], %s1266_s13 }
  0x13   : > { %s230_s14 = sadd.s32 (%p46_p3), %s1670_s25, %s1566_s12 }
  0x14   : > { %s1269_s15 = sshll.u32 (%p46_p3), %s230_s14, 2 }
  0x15   : > { %s1776_s18 = scalar_lea.vmem %s1992_s0, %s1269_s15 }
  0x16   : > { %v249_v0 = vld [vmem:[%s1776_s18] sm:$0xf]  ;;  %v251_v1 = vld [vmem:[%s1776_s18 + $0xc] sm:$0xf]  ;;  %v253_v2 = vld [vmem:[%s1776_s18 + $0x18] sm:$0xf] }
  0x17   : > { %250 = vst [vmem:[%s227_s19] sm:$0xf] %v249_v0  ;;  %252 = vst [vmem:[%s227_s19 + $0x4] sm:$0xf] %v251_v1  ;;  %v255_v3 = vld [vmem:[%s1776_s18 + $0x24] sm:$0xf] }
  0x18   : > { %254 = vst [vmem:[%s227_s19 + $0x8] sm:$0xf] %v253_v2  ;;  %v257_v4 = vld [vmem:[%s1776_s18 + $0x30] sm:$0xf]  ;;  %v259_v5 = vld [vmem:[%s1776_s18 + $0x3c] sm:$0xf] }
  0x19   : > { %256 = vst [vmem:[%s227_s19 + $0xc] sm:$0xf] %v255_v3  ;;  %258 = vst [vmem:[%s227_s19 + $0x10] sm:$0xf] %v257_v4  ;;  %v261_v6 = vld [vmem:[%s1776_s18 + $0x48] sm:$0xf] }
  0x1a   : > { %260 = vst [vmem:[%s227_s19 + $0x14] sm:$0xf] %v259_v5  ;;  %v263_v7 = vld [vmem:[%s1776_s18 + $0x54] sm:$0xf]  ;;  %v265_v8 = vld [vmem:[%s1776_s18 + $0x60] sm:$0xf] }
  0x1b   : > { %262 = vst [vmem:[%s227_s19 + $0x18] sm:$0xf] %v261_v6  ;;  %264 = vst [vmem:[%s227_s19 + $0x1c] sm:$0xf] %v263_v7  ;;  %v267_v9 = vld [vmem:[%s1776_s18 + $0x6c] sm:$0xf] }
  0x1c   : > { %266 = vst [vmem:[%s227_s19 + $0x20] sm:$0xf] %v265_v8  ;;  %v269_v10 = vld [vmem:[%s1776_s18 + $0x78] sm:$0xf]  ;;  %v271_v11 = vld [vmem:[%s1776_s18 + $0x84] sm:$0xf] }
  0x1d   : > { %268 = vst [vmem:[%s227_s19 + $0x24] sm:$0xf] %v267_v9  ;;  %270 = vst [vmem:[%s227_s19 + $0x28] sm:$0xf] %v269_v10  ;;  %v273_v12 = vld [vmem:[%s1776_s18 + $0x90] sm:$0xf] }
  0x1e   : > { %272 = vst [vmem:[%s227_s19 + $0x2c] sm:$0xf] %v271_v11  ;;  %v275_v13 = vld [vmem:[%s1776_s18 + $0x9c] sm:$0xf]  ;;  %v277_v14 = vld [vmem:[%s1776_s18 + $0xa8] sm:$0xf] }
  0x1f   : > { %274 = vst [vmem:[%s227_s19 + $0x30] sm:$0xf] %v273_v12  ;;  %276 = vst [vmem:[%s227_s19 + $0x34] sm:$0xf] %v275_v13  ;;  %v279_v15 = vld [vmem:[%s1776_s18 + $0xb4] sm:$0xf] }
  0x20   : > { %278 = vst [vmem:[%s227_s19 + $0x38] sm:$0xf] %v277_v14  ;;  %280 = vst [vmem:[%s227_s19 + $0x3c] sm:$0xf] %v279_v15 }
  0x21 PF: > { %p1270_p7 = scmp.ge.s32.totalorder %s1678_s27, 1  ;;  %p353_p8 = scmp.lt.s32.totalorder %s1678_s27, 10 }
  0x23   : > { %p354_p9 = pnand %p1270_p7, %p353_p8 }
  0x24   : > { %s360_s20 = sand.u32 (!%p354_p9), 1, %s1654_s21   ;;  %s1272_s30 = sshll.u32 (!%p354_p9), %s1662_s23, 4 }
  0x25   : > { %357 = sbr.rel (%p354_p9) target bundleno = 540 (0x21c), region = 81  ;;  %s1271_s7 = sshll.u32 (!%p354_p9), %s360_s20, 6 }
  0x26   : > { %p401_p10 = scmp.lt.s32.totalorder (!%p354_p9), %s1272_s30, 47  ;;  %s1274_s8 = sshll.u32 (!%p354_p9), %s1666_s24, 4 }
  0x27   : > { %p407_p11 = scmp.lt.s32.totalorder (!%p354_p9), %s1274_s8, 47  ;;  %s1814_s24 = scalar_lea.vmem (!%p354_p9), [#allocation3], %s1271_s7 }
  0x28   : > { %p1278_p12 = scmp.ne.s32.totalorder (!%p354_p9), %s1662_s23, 0 }
  0x2a   : > { %s2012_s30 = smov (!%p401_p10, %s1272_s30), 47  ;;  %s2014_s8 = smov (!%p407_p11, %s1274_s8), 47 }
  0x2b   : > { %s1273_s9 = sshll.u32 %s2012_s30, 3  ;;  %s1275_s14 = sshll.u32 %s2014_s8, 3 }
  0x2c   : > { %s1802_s13 = scalar_lea.vmem %s1993_s1, %s1273_s9  ;;  %s1807_s17 = scalar_lea.vmem %s1994_s2, %s1275_s14 }
  0x2d   : > { %s1812_s19 = scalar_lea.vmem %s1998_s6, %s1275_s14  ;;  %421 = sbr.rel (%p1278_p12) target bundleno = 59 (0x3b), region = 89 }
  0x32   : > { %vm422_vm0 = vcmask 130048   ;;  %v1680_v16 = vmov 0.0  }
  0x33   : > { %423 = vst.msk [vmem:[#allocation2] sm:$0xff] %vm422_vm0, %v1680_v16  ;;  %424 = vst.msk [vmem:[#allocation2 + $0x8] sm:$0xff] %vm422_vm0, %v1680_v16 }
  0x34   : > { %425 = vst.msk [vmem:[#allocation2 + $0x10] sm:$0xff] %vm422_vm0, %v1680_v16  ;;  %426 = vst.msk [vmem:[#allocation2 + $0x18] sm:$0xff] %vm422_vm0, %v1680_v16 }
  0x35   : > { %427 = vst.msk [vmem:[#allocation2 + $0x20] sm:$0xff] %vm422_vm0, %v1680_v16  ;;  %428 = vst.msk [vmem:[#allocation2 + $0x28] sm:$0xff] %vm422_vm0, %v1680_v16 }
  0x36   : > { %429 = vst.msk [vmem:[#allocation2 + $0x30] sm:$0xff] %vm422_vm0, %v1680_v16  ;;  %430 = vst.msk [vmem:[#allocation2 + $0x38] sm:$0xff] %vm422_vm0, %v1680_v16 }
  0x37   : > { %431 = vst.msk [vmem:[#allocation2 + $0x40] sm:$0xff] %vm422_vm0, %v1680_v16  ;;  %432 = vst.msk [vmem:[#allocation2 + $0x48] sm:$0xff] %vm422_vm0, %v1680_v16 }
  0x38   : > { %433 = vst.msk [vmem:[#allocation2 + $0x50] sm:$0xff] %vm422_vm0, %v1680_v16  ;;  %434 = vst.msk [vmem:[#allocation2 + $0x58] sm:$0xff] %vm422_vm0, %v1680_v16 }
  0x39   : > { %435 = vst.msk [vmem:[#allocation2 + $0x60] sm:$0xff] %vm422_vm0, %v1680_v16  ;;  %436 = vst.msk [vmem:[#allocation2 + $0x68] sm:$0xff] %vm422_vm0, %v1680_v16 }
  0x3a   : > { %437 = vst.msk [vmem:[#allocation2 + $0x70] sm:$0xff] %vm422_vm0, %v1680_v16  ;;  %438 = vst.msk [vmem:[#allocation2 + $0x78] sm:$0xff] %vm422_vm0, %v1680_v16 }
  0x3b PF: > { %v502_v17 = vld [vmem:[%s1802_s13 + $0x78] sm:$0xff]  ;;  %v501_v18 = vld [vmem:[%s1802_s13 + $0x70] sm:$0xff]  ;;  %v500_v19 = vld [vmem:[%s1802_s13 + $0x68] sm:$0xff]  ;;  %vm664_vm1 = vcmask 130048   ;;  %p1279_p13 = scmp.ne.s32.totalorder %s1662_s23, 2 }
  0x3c   : > { %1422 = vmatprep.subr.mxu0 %v502_v17  ;;  %1534 = vmatprep.subr.mxu1 %v502_v17  ;;  %v499_v20 = vld [vmem:[%s1802_s13 + $0x60] sm:$0xff]  ;;  %v498_v21 = vld [vmem:[%s1802_s13 + $0x58] sm:$0xff]  ;;  %v497_v22 = vld [vmem:[%s1802_s13 + $0x50] sm:$0xff] }
  0x3d   : > { %1423 = vmatpush3.msra.mxu0 %v502_v17  ;;  %1550 = vmatpush3.msra.mxu1 %v502_v17  ;;  %v496_v23 = vld [vmem:[%s1802_s13 + $0x48] sm:$0xff]  ;;  %v495_v24 = vld [vmem:[%s1802_s13 + $0x40] sm:$0xff]  ;;  %v494_v25 = vld [vmem:[%s1802_s13 + $0x38] sm:$0xff] }
  0x3e   : > { %1424 = vmatprep.subr.mxu0 %v501_v18  ;;  %1535 = vmatprep.subr.mxu1 %v501_v18  ;;  %v493_v26 = vld [vmem:[%s1802_s13 + $0x30] sm:$0xff]  ;;  %v492_v27 = vld [vmem:[%s1802_s13 + $0x28] sm:$0xff]  ;;  %v491_v28 = vld [vmem:[%s1802_s13 + $0x20] sm:$0xff] }
  0x3f   : > { %1425 = vmatpush3.msra.mxu0 %v501_v18  ;;  %1551 = vmatpush3.msra.mxu1 %v501_v18  ;;  %v490_v29 = vld [vmem:[%s1802_s13 + $0x18] sm:$0xff]  ;;  %v489_v30 = vld [vmem:[%s1802_s13 + $0x10] sm:$0xff]  ;;  %v488_v31 = vld [vmem:[%s1802_s13 + $0x8] sm:$0xff] }
  0x40   : > { %1426 = vmatprep.subr.mxu0 %v500_v19  ;;  %1536 = vmatprep.subr.mxu1 %v500_v19  ;;  %v1316_v32 = vld [vmem:[%s1814_s24] sm:$0xff]   ;;  %v1347_v35 = vld [vmem:[%s1814_s24 + $0x8] sm:$0xff]   ;;  %v1348_v43 = vld [vmem:[%s1814_s24 + $0x10] sm:$0xff]  }
  0x41   : > { %1427 = vmatpush3.msra.mxu0 %v500_v19  ;;  %1552 = vmatpush3.msra.mxu1 %v500_v19  ;;  %v1350_v33 = vld [vmem:[%s1814_s24 + $0x20] sm:$0xff]   ;;  %v1351_v36 = vld [vmem:[%s1814_s24 + $0x28] sm:$0xff]   ;;  %v1317_v37 = vunpack.c.l.bf16 %v1316_v32  ;;  %v1318_v39 = vunpack.c.h.bf16 %v1316_v32  ;;  %v1321_v41 = vunpack.c.l.bf16 %v1347_v35  ;;  %v1352_v44 = vld [vmem:[%s1814_s24 + $0x30] sm:$0xff]   ;;  %v1322_v45 = vunpack.c.h.bf16 %v1347_v35 }
  0x42   : > { %1428 = vmatprep.subr.mxu0 %v499_v20  ;;  %1537 = vmatprep.subr.mxu1 %v499_v20  ;;  %v487_v34 = vld [vmem:[%s1802_s13] sm:$0xff]  ;;  %v1333_v38 = vunpack.c.l.bf16 %v1350_v33  ;;  %v1334_v40 = vunpack.c.h.bf16 %v1350_v33  ;;  %v1337_v42 = vunpack.c.l.bf16 %v1351_v36  ;;  %v1338_v46 = vunpack.c.h.bf16 %v1351_v36  ;;  %v1349_v49 = vld [vmem:[%s1814_s24 + $0x18] sm:$0xff]   ;;  %v440_v57 = vld [vmem:[#allocation2 + $0x8] sm:$0xff] }
  0x43   : > { %1429 = vmatpush3.msra.mxu0 %v499_v20  ;;  %1553 = vmatpush3.msra.mxu1 %v499_v20  ;;  %v1325_v47 = vunpack.c.l.bf16 %v1348_v43  ;;  %v1341_v48 = vunpack.c.l.bf16 %v1352_v44  ;;  %v1353_v50 = vld [vmem:[%s1814_s24 + $0x38] sm:$0xff]   ;;  %v1326_v51 = vunpack.c.h.bf16 %v1348_v43  ;;  %v1342_v52 = vunpack.c.h.bf16 %v1352_v44  ;;  %v448_v58 = vld [vmem:[#allocation2 + $0x48] sm:$0xff]  ;;  %v439_v61 = vld [vmem:[#allocation2] sm:$0xff] }
  0x44   : > { %1430 = vmatprep.subr.mxu0 %v498_v21  ;;  %1538 = vmatprep.subr.mxu1 %v498_v21  ;;  %v1329_v53 = vunpack.c.l.bf16 %v1349_v49  ;;  %v1345_v54 = vunpack.c.l.bf16 %v1353_v50  ;;  %v1330_v55 = vunpack.c.h.bf16 %v1349_v49  ;;  %v1346_v56 = vunpack.c.h.bf16 %v1353_v50  ;;  %v447_v62 = vld [vmem:[#allocation2 + $0x40] sm:$0xff]  ;;  %v442_v3 = vld [vmem:[#allocation2 + $0x18] sm:$0xff]  ;;  %v441_v9 = vld [vmem:[#allocation2 + $0x10] sm:$0xff] }
  0x45   : > { %1431 = vmatpush3.msra.mxu0 %v498_v21  ;;  %1554 = vmatpush3.msra.mxu1 %v498_v21  ;;  %v450_v4 = vld [vmem:[#allocation2 + $0x58] sm:$0xff]  ;;  %v449_v10 = vld [vmem:[#allocation2 + $0x50] sm:$0xff]  ;;  %v444_v15 = vld [vmem:[#allocation2 + $0x28] sm:$0xff] }
  0x46   : > { %1432 = vmatprep.subr.mxu0 %v497_v22  ;;  %1539 = vmatprep.subr.mxu1 %v497_v22  ;;  %v452_v16 = vld [vmem:[#allocation2 + $0x68] sm:$0xff]  ;;  %v443_v21 = vld [vmem:[#allocation2 + $0x20] sm:$0xff]  ;;  %v445_v33 = vld [vmem:[#allocation2 + $0x30] sm:$0xff] }
  0x47   : > { %1433 = vmatpush3.msra.mxu0 %v497_v22  ;;  %1555 = vmatpush3.msra.mxu1 %v497_v22  ;;  %v451_v22 = vld [vmem:[#allocation2 + $0x60] sm:$0xff] }
  0x48   : > { %1434 = vmatprep.subr.mxu0 %v496_v23  ;;  %1540 = vmatprep.subr.mxu1 %v496_v23 }
  0x49   : > { %1435 = vmatpush3.msra.mxu0 %v496_v23  ;;  %1556 = vmatpush3.msra.mxu1 %v496_v23 }
  0x4a   : > { %1436 = vmatprep.subr.mxu0 %v495_v24  ;;  %1541 = vmatprep.subr.mxu1 %v495_v24 }
  0x4b   : > { %1437 = vmatpush3.msra.mxu0 %v495_v24  ;;  %1557 = vmatpush3.msra.mxu1 %v495_v24 }
  0x4c   : > { %1438 = vmatprep.subr.mxu0 %v494_v25  ;;  %1542 = vmatprep.subr.mxu1 %v494_v25 }
  0x4d   : > { %1439 = vmatpush3.msra.mxu0 %v494_v25  ;;  %1558 = vmatpush3.msra.mxu1 %v494_v25 }
  0x4e   : > { %1440 = vmatprep.subr.mxu0 %v493_v26  ;;  %1543 = vmatprep.subr.mxu1 %v493_v26 }
  0x4f   : > { %1441 = vmatpush3.msra.mxu0 %v493_v26  ;;  %1559 = vmatpush3.msra.mxu1 %v493_v26 }
  0x50   : > { %1442 = vmatprep.subr.mxu0 %v492_v27  ;;  %1544 = vmatprep.subr.mxu1 %v492_v27 }
  0x51   : > { %1443 = vmatpush3.msra.mxu0 %v492_v27  ;;  %1560 = vmatpush3.msra.mxu1 %v492_v27  ;;  %v446_v27 = vld [vmem:[#allocation2 + $0x38] sm:$0xff] }
  0x52   : > { %1444 = vmatprep.subr.mxu0 %v491_v28  ;;  %1545 = vmatprep.subr.mxu1 %v491_v28 }
  0x53   : > { %1445 = vmatpush3.msra.mxu0 %v491_v28  ;;  %1561 = vmatpush3.msra.mxu1 %v491_v28  ;;  %v454_v28 = vld [vmem:[#allocation2 + $0x78] sm:$0xff] }
  0x54   : > { %1446 = vmatprep.subr.mxu0 %v490_v29  ;;  %1546 = vmatprep.subr.mxu1 %v490_v29 }
  0x55   : > { %1447 = vmatpush3.msra.mxu0 %v490_v29  ;;  %1562 = vmatpush3.msra.mxu1 %v490_v29 }
  0x56   : > { %1448 = vmatprep.subr.mxu0 %v489_v30  ;;  %1547 = vmatprep.subr.mxu1 %v489_v30 }
  0x57   : > { %1449 = vmatpush3.msra.mxu0 %v489_v30  ;;  %1563 = vmatpush3.msra.mxu1 %v489_v30 }
  0x58   : > { %1450 = vmatprep.subr.mxu0 %v488_v31  ;;  %1548 = vmatprep.subr.mxu1 %v488_v31 }
  0x59   : > { %1451 = vmatpush3.msra.mxu0 %v488_v31  ;;  %1564 = vmatpush3.msra.mxu1 %v488_v31 }
  0x5a   : > { %1452 = vmatprep.subr.mxu0 %v487_v34  ;;  %1549 = vmatprep.subr.mxu1 %v487_v34 }
  0x5b   : > { %1453 = vmatpush3.msra.mxu0 %v487_v34  ;;  %1565 = vmatpush3.msra.mxu1 %v487_v34  ;;  %v453_v34 = vld [vmem:[#allocation2 + $0x70] sm:$0xff] }
  0x5c   : > { %1454 = vmatprep.mubr.f32.mxu0 %v1317_v37  ;;  %1466 = vmatprep.mubr.f32.mxu1 %v1333_v38 }
  0x5d   : > { %1455 = vmatmul.mubr.f32.vlgmr.msra.gmra.mxu0 %v1318_v39  ;;  %1467 = vmatmul.mubr.f32.vlgmr.msra.gmra.mxu1 %v1334_v40 }
  0x5e   : > { %1457 = vmatprep.mubr.f32.mxu0 %v1321_v41  ;;  %1469 = vmatprep.mubr.f32.mxu1 %v1337_v42 }
  0x61   : > { %1458 = vmatmul.mubr.f32.gmra.mxu0 %v1322_v45  ;;  %1470 = vmatmul.mubr.f32.gmra.mxu1 %v1338_v46 }
  0x62   : > { %1460 = vmatprep.mubr.f32.mxu0 %v1325_v47  ;;  %1472 = vmatprep.mubr.f32.mxu1 %v1341_v48 }
  0x65   : > { %1461 = vmatmul.mubr.f32.gmra.mxu0 %v1326_v51  ;;  %1473 = vmatmul.mubr.f32.gmra.mxu1 %v1342_v52 }
  0x66   : > { %1463 = vmatprep.mubr.f32.mxu0 %v1329_v53  ;;  %1475 = vmatprep.mubr.f32.mxu1 %v1345_v54 }
  0x69   : > { %1464 = vmatmul.mubr.f32.gmra.mxu0 %v1330_v55  ;;  %1476 = vmatmul.mubr.f32.gmra.mxu1 %v1346_v56 }
 0x11d   : > { %v1456_v59 = vpop.f32.mrf.mxu0  ;;  %v1468_v60 = vpop.f32.mrf.mxu1 }
 0x11e   : > { %v649_v63 = vadd.f32 %v1456_v59, %v440_v57  ;;  %v657_v0 = vadd.f32 %v1468_v60, %v448_v58 }
 0x11f   : > { %v569_v1 = vpop.f32.mrf.mxu0  ;;  %v609_v2 = vpop.f32.mrf.mxu1 }
 0x120   : > { %666 = vst.msk [vmem:[#allocation2 + $0x8] sm:$0xff] %vm664_vm1, %v649_v63  ;;  %674 = vst.msk [vmem:[#allocation2 + $0x48] sm:$0xff] %vm664_vm1, %v657_v0  ;;  %v648_v5 = vadd.f32 %v569_v1, %v439_v61  ;;  %v656_v6 = vadd.f32 %v609_v2, %v447_v62 }
 0x121   : > { %v1459_v7 = vpop.f32.mrf.mxu0  ;;  %v1471_v8 = vpop.f32.mrf.mxu1 }
 0x122   : > { %665 = vst.msk [vmem:[#allocation2] sm:$0xff] %vm664_vm1, %v648_v5  ;;  %673 = vst.msk [vmem:[#allocation2 + $0x40] sm:$0xff] %vm664_vm1, %v656_v6  ;;  %v651_v11 = vadd.f32 %v1459_v7, %v442_v3  ;;  %v659_v12 = vadd.f32 %v1471_v8, %v450_v4 }
 0x123   : > { %v579_v13 = vpop.f32.mrf.mxu0  ;;  %v619_v14 = vpop.f32.mrf.mxu1 }
 0x124   : > { %668 = vst.msk [vmem:[#allocation2 + $0x18] sm:$0xff] %vm664_vm1, %v651_v11  ;;  %676 = vst.msk [vmem:[#allocation2 + $0x58] sm:$0xff] %vm664_vm1, %v659_v12  ;;  %v650_v17 = vadd.f32 %v579_v13, %v441_v9  ;;  %v658_v18 = vadd.f32 %v619_v14, %v449_v10 }
 0x125   : > { %v1462_v19 = vpop.f32.mrf.mxu0  ;;  %v1474_v20 = vpop.f32.mrf.mxu1 }
 0x126   : > { %667 = vst.msk [vmem:[#allocation2 + $0x10] sm:$0xff] %vm664_vm1, %v650_v17  ;;  %675 = vst.msk [vmem:[#allocation2 + $0x50] sm:$0xff] %vm664_vm1, %v658_v18  ;;  %v653_v23 = vadd.f32 %v1462_v19, %v444_v15  ;;  %v661_v24 = vadd.f32 %v1474_v20, %v452_v16 }
 0x127   : > { %v589_v25 = vpop.f32.mrf.mxu0  ;;  %v629_v26 = vpop.f32.mrf.mxu1 }
 0x128   : > { %670 = vst.msk [vmem:[#allocation2 + $0x28] sm:$0xff] %vm664_vm1, %v653_v23  ;;  %678 = vst.msk [vmem:[#allocation2 + $0x68] sm:$0xff] %vm664_vm1, %v661_v24  ;;  %v652_v29 = vadd.f32 %v589_v25, %v443_v21  ;;  %v660_v30 = vadd.f32 %v629_v26, %v451_v22 }
 0x129   : > { %v1465_v31 = vpop.f32.mrf.mxu0  ;;  %v1477_v32 = vpop.f32.mrf.mxu1 }
 0x12a   : > { %669 = vst.msk [vmem:[#allocation2 + $0x20] sm:$0xff] %vm664_vm1, %v652_v29  ;;  %677 = vst.msk [vmem:[#allocation2 + $0x60] sm:$0xff] %vm664_vm1, %v660_v30  ;;  %v655_v35 = vadd.f32 %v1465_v31, %v446_v27  ;;  %v663_v36 = vadd.f32 %v1477_v32, %v454_v28  ;;  %684 = sbr.rel (%p1279_p13) target bundleno = 540 (0x21c), region = 93 }
 0x12b   : > { %v599_v37 = vpop.f32.mrf.mxu0  ;;  %v639_v38 = vpop.f32.mrf.mxu1 }
 0x12c   : > { %672 = vst.msk [vmem:[#allocation2 + $0x38] sm:$0xff] %vm664_vm1, %v655_v35  ;;  %680 = vst.msk [vmem:[#allocation2 + $0x78] sm:$0xff] %vm664_vm1, %v663_v36  ;;  %v654_v39 = vadd.f32 %v599_v37, %v445_v33  ;;  %v662_v40 = vadd.f32 %v639_v38, %v453_v34 }
 0x12e   : > { %671 = vst.msk [vmem:[#allocation2 + $0x30] sm:$0xff] %vm664_vm1, %v654_v39  ;;  %679 = vst.msk [vmem:[#allocation2 + $0x70] sm:$0xff] %vm664_vm1, %v662_v40 }
 0x12f   : > { %v720_v41 = vld [vmem:[%s1996_s4 + $0x8] sm:$0xff]  ;;  %v719_v43 = vld [vmem:[%s1996_s4] sm:$0xff]  ;;  %v703_v49 = vld [vmem:[%s1807_s17 + $0x10] sm:$0xff] }
 0x130   : > { %v718_v42 = vld [vmem:[%s1995_s3 + $0x8] sm:$0xff]  ;;  %1478 = vmatprep.subr.mxu0 %v720_v41  ;;  %v717_v44 = vld [vmem:[%s1995_s3] sm:$0xff]  ;;  %v687_v50 = vld [vmem:[#allocation2 + $0x10] sm:$0xff] }
 0x131   : > { %1506 = vmatprep.subr.mxu1 %v718_v42  ;;  %v701_v45 = vld [vmem:[%s1807_s17] sm:$0xff]  ;;  %1479 = vmatpush3.msra.mxu0 %v720_v41  ;;  %v702_v47 = vld [vmem:[%s1807_s17 + $0x8] sm:$0xff]  ;;  %v704_v51 = vld [vmem:[%s1807_s17 + $0x18] sm:$0xff] }
 0x132   : > { %1507 = vmatpush3.msra.mxu1 %v718_v42  ;;  %v685_v46 = vld [vmem:[#allocation2] sm:$0xff]  ;;  %1480 = vmatprep.subr.mxu0 %v719_v43  ;;  %v686_v48 = vld [vmem:[#allocation2 + $0x8] sm:$0xff]  ;;  %v688_v52 = vld [vmem:[#allocation2 + $0x18] sm:$0xff] }
 0x133   : > { %1508 = vmatprep.subr.mxu1 %v717_v44  ;;  %1481 = vmatpush3.msra.mxu0 %v719_v43  ;;  %v705_v53 = vld [vmem:[%s1807_s17 + $0x20] sm:$0xff]  ;;  %v706_v55 = vld [vmem:[%s1807_s17 + $0x28] sm:$0xff]  ;;  %v707_v57 = vld [vmem:[%s1807_s17 + $0x30] sm:$0xff] }
 0x134   : > { %1482 = vmatprep.mubr.msk.f32.mxu0 %vm664_vm1, %v701_v45  ;;  %1509 = vmatpush3.msra.mxu1 %v717_v44  ;;  %v689_v54 = vld [vmem:[#allocation2 + $0x20] sm:$0xff]  ;;  %v690_v56 = vld [vmem:[#allocation2 + $0x28] sm:$0xff]  ;;  %v708_v59 = vld [vmem:[%s1807_s17 + $0x38] sm:$0xff] }
 0x135   : > { %1510 = vmatprep.mubr.msk.f32.mxu1 %vm664_vm1, %v685_v46  ;;  %1483 = vmatmul.mubr.msk.f32.vlgmr.msra.gmra.mxu0 %vm664_vm1, %v702_v47  ;;  %v691_v58 = vld [vmem:[#allocation2 + $0x30] sm:$0xff]  ;;  %v692_v60 = vld [vmem:[#allocation2 + $0x38] sm:$0xff]  ;;  %v709_v61 = vld [vmem:[%s1807_s17 + $0x40] sm:$0xff] }
 0x136   : > { %1511 = vmatmul.mubr.msk.f32.vlgmr.msra.gmra.mxu1 %vm664_vm1, %v686_v48  ;;  %1485 = vmatprep.mubr.msk.f32.mxu0 %vm664_vm1, %v703_v49  ;;  %v693_v62 = vld [vmem:[#allocation2 + $0x40] sm:$0xff]  ;;  %v710_v63 = vld [vmem:[%s1807_s17 + $0x48] sm:$0xff]  ;;  %v711_v1 = vld [vmem:[%s1807_s17 + $0x50] sm:$0xff] }
 0x137   : > { %1513 = vmatprep.mubr.msk.f32.mxu1 %vm664_vm1, %v687_v50  ;;  %v694_v0 = vld [vmem:[#allocation2 + $0x48] sm:$0xff]  ;;  %v695_v2 = vld [vmem:[#allocation2 + $0x50] sm:$0xff]  ;;  %v712_v3 = vld [vmem:[%s1807_s17 + $0x58] sm:$0xff] }
 0x138   : > { %v696_v4 = vld [vmem:[#allocation2 + $0x58] sm:$0xff]  ;;  %v713_v5 = vld [vmem:[%s1807_s17 + $0x60] sm:$0xff]  ;;  %v714_v7 = vld [vmem:[%s1807_s17 + $0x68] sm:$0xff] }
 0x139   : > { %1486 = vmatmul.mubr.msk.f32.gmra.mxu0 %vm664_vm1, %v704_v51  ;;  %v697_v6 = vld [vmem:[#allocation2 + $0x60] sm:$0xff]  ;;  %v698_v8 = vld [vmem:[#allocation2 + $0x68] sm:$0xff]  ;;  %v715_v9 = vld [vmem:[%s1807_s17 + $0x70] sm:$0xff] }
 0x13a   : > { %1514 = vmatmul.mubr.msk.f32.gmra.mxu1 %vm664_vm1, %v688_v52  ;;  %1488 = vmatprep.mubr.msk.f32.mxu0 %vm664_vm1, %v705_v53  ;;  %v699_v10 = vld [vmem:[#allocation2 + $0x70] sm:$0xff]  ;;  %v716_v11 = vld [vmem:[%s1807_s17 + $0x78] sm:$0xff]  ;;  %v1937_v15 = vld [vmem:[%s1997_s5] ss:$0 sm:$0xff] }
 0x13b   : > { %1516 = vmatprep.mubr.msk.f32.mxu1 %vm664_vm1, %v689_v54  ;;  %v700_v12 = vld [vmem:[#allocation2 + $0x78] sm:$0xff] }
 0x13d   : > { %1489 = vmatmul.mubr.msk.f32.gmra.mxu0 %vm664_vm1, %v706_v55 }
 0x13e   : > { %1517 = vmatmul.mubr.msk.f32.gmra.mxu1 %vm664_vm1, %v690_v56  ;;  %1491 = vmatprep.mubr.msk.f32.mxu0 %vm664_vm1, %v707_v57 }
 0x13f   : > { %1519 = vmatprep.mubr.msk.f32.mxu1 %vm664_vm1, %v691_v58 }
 0x141   : > { %1492 = vmatmul.mubr.msk.f32.gmra.mxu0 %vm664_vm1, %v708_v59 }
 0x142   : > { %1520 = vmatmul.mubr.msk.f32.gmra.mxu1 %vm664_vm1, %v692_v60  ;;  %1494 = vmatprep.mubr.msk.f32.mxu0 %vm664_vm1, %v709_v61 }
 0x143   : > { %1522 = vmatprep.mubr.msk.f32.mxu1 %vm664_vm1, %v693_v62 }
 0x145   : > { %1495 = vmatmul.mubr.msk.f32.gmra.mxu0 %vm664_vm1, %v710_v63 }
 0x146   : > { %1523 = vmatmul.mubr.msk.f32.gmra.mxu1 %vm664_vm1, %v694_v0  ;;  %1497 = vmatprep.mubr.msk.f32.mxu0 %vm664_vm1, %v711_v1 }
 0x147   : > { %1525 = vmatprep.mubr.msk.f32.mxu1 %vm664_vm1, %v695_v2 }
 0x149   : > { %1498 = vmatmul.mubr.msk.f32.gmra.mxu0 %vm664_vm1, %v712_v3 }
 0x14a   : > { %1526 = vmatmul.mubr.msk.f32.gmra.mxu1 %vm664_vm1, %v696_v4  ;;  %1500 = vmatprep.mubr.msk.f32.mxu0 %vm664_vm1, %v713_v5 }
 0x14b   : > { %1528 = vmatprep.mubr.msk.f32.mxu1 %vm664_vm1, %v697_v6 }
 0x14d   : > { %1501 = vmatmul.mubr.msk.f32.gmra.mxu0 %vm664_vm1, %v714_v7 }
 0x14e   : > { %1529 = vmatmul.mubr.msk.f32.gmra.mxu1 %vm664_vm1, %v698_v8  ;;  %1503 = vmatprep.mubr.msk.f32.mxu0 %vm664_vm1, %v715_v9 }
 0x14f   : > { %1531 = vmatprep.mubr.msk.f32.mxu1 %vm664_vm1, %v699_v10 }
 0x151   : > { %1504 = vmatmul.mubr.msk.f32.gmra.mxu0 %vm664_vm1, %v716_v11 }
 0x152   : > { %1532 = vmatmul.mubr.msk.f32.gmra.mxu1 %vm664_vm1, %v700_v12 }
 0x1f5   : > { %v1484_v13 = vpop.f32.mrf.mxu0 }
 0x1f6   : > { %v1512_v14 = vpop.f32.mrf.mxu1 }
 0x1f7   : > { %v1034_v16 = vadd.f32 %v1512_v14, %v1484_v13  ;;  %v835_v17 = vpop.f32.mrf.mxu0 }
 0x1f8   : > { %v1028_v18 = vpop.f32.mrf.mxu1 }
 0x1f9   : > { %v1115_v19 = vadd.f32 %v1937_v15, %v1034_v16  ;;  %v1029_v20 = vadd.f32 %v1028_v18, %v835_v17  ;;  %v1487_v21 = vpop.f32.mrf.mxu0 }
 0x1fa   : > { %v1515_v22 = vpop.f32.mrf.mxu1 }
 0x1fb   : > { %v1131_v23 = vmax.f32 %v1115_v19, 0.0  ;;  %v1114_v24 = vadd.f32 %v1937_v15, %v1029_v20  ;;  %v1044_v25 = vadd.f32 %v1515_v22, %v1487_v21  ;;  %v845_v26 = vpop.f32.mrf.mxu0 }
 0x1fc   : > { %v1038_v27 = vpop.f32.mrf.mxu1 }
 0x1fd   : > { %1147 = vst [vmem:[%s1812_s19 + $0x8] sm:$0xff] %v1131_v23  ;;  %v1130_v28 = vmax.f32 %v1114_v24, 0.0  ;;  %v1117_v29 = vadd.f32 %v1937_v15, %v1044_v25  ;;  %v1039_v30 = vadd.f32 %v1038_v27, %v845_v26  ;;  %v1490_v31 = vpop.f32.mrf.mxu0 }
 0x1fe   : > { %v1518_v32 = vpop.f32.mrf.mxu1 }
 0x1ff   : > { %1146 = vst [vmem:[%s1812_s19] sm:$0xff] %v1130_v28  ;;  %v1133_v33 = vmax.f32 %v1117_v29, 0.0  ;;  %v1116_v34 = vadd.f32 %v1937_v15, %v1039_v30  ;;  %v1054_v35 = vadd.f32 %v1518_v32, %v1490_v31  ;;  %v855_v36 = vpop.f32.mrf.mxu0 }
 0x200   : > { %v1048_v37 = vpop.f32.mrf.mxu1 }
 0x201   : > { %1149 = vst [vmem:[%s1812_s19 + $0x18] sm:$0xff] %v1133_v33  ;;  %v1132_v38 = vmax.f32 %v1116_v34, 0.0  ;;  %v1119_v39 = vadd.f32 %v1937_v15, %v1054_v35  ;;  %v1049_v40 = vadd.f32 %v1048_v37, %v855_v36  ;;  %v1493_v41 = vpop.f32.mrf.mxu0 }
 0x202   : > { %v1521_v42 = vpop.f32.mrf.mxu1 }
 0x203   : > { %1148 = vst [vmem:[%s1812_s19 + $0x10] sm:$0xff] %v1132_v38  ;;  %v1135_v43 = vmax.f32 %v1119_v39, 0.0  ;;  %v1118_v44 = vadd.f32 %v1937_v15, %v1049_v40  ;;  %v1064_v45 = vadd.f32 %v1521_v42, %v1493_v41  ;;  %v865_v46 = vpop.f32.mrf.mxu0 }
 0x204   : > { %v1058_v47 = vpop.f32.mrf.mxu1 }
 0x205   : > { %1151 = vst [vmem:[%s1812_s19 + $0x28] sm:$0xff] %v1135_v43  ;;  %v1134_v48 = vmax.f32 %v1118_v44, 0.0  ;;  %v1121_v49 = vadd.f32 %v1937_v15, %v1064_v45  ;;  %v1059_v50 = vadd.f32 %v1058_v47, %v865_v46  ;;  %v1496_v51 = vpop.f32.mrf.mxu0 }
 0x206   : > { %v1524_v52 = vpop.f32.mrf.mxu1 }
 0x207   : > { %1150 = vst [vmem:[%s1812_s19 + $0x20] sm:$0xff] %v1134_v48  ;;  %v1137_v53 = vmax.f32 %v1121_v49, 0.0  ;;  %v1120_v54 = vadd.f32 %v1937_v15, %v1059_v50  ;;  %v1074_v55 = vadd.f32 %v1524_v52, %v1496_v51  ;;  %v875_v56 = vpop.f32.mrf.mxu0 }
 0x208   : > { %v1068_v57 = vpop.f32.mrf.mxu1 }
 0x209   : > { %1153 = vst [vmem:[%s1812_s19 + $0x38] sm:$0xff] %v1137_v53  ;;  %v1136_v58 = vmax.f32 %v1120_v54, 0.0  ;;  %v1123_v59 = vadd.f32 %v1937_v15, %v1074_v55  ;;  %v1069_v60 = vadd.f32 %v1068_v57, %v875_v56  ;;  %v1499_v61 = vpop.f32.mrf.mxu0 }
 0x20a   : > { %v1527_v62 = vpop.f32.mrf.mxu1 }
 0x20b   : > { %1152 = vst [vmem:[%s1812_s19 + $0x30] sm:$0xff] %v1136_v58  ;;  %v1139_v63 = vmax.f32 %v1123_v59, 0.0  ;;  %v1122_v0 = vadd.f32 %v1937_v15, %v1069_v60  ;;  %v1084_v1 = vadd.f32 %v1527_v62, %v1499_v61  ;;  %v885_v2 = vpop.f32.mrf.mxu0 }
 0x20c   : > { %v1078_v3 = vpop.f32.mrf.mxu1 }
 0x20d   : > { %1155 = vst [vmem:[%s1812_s19 + $0x48] sm:$0xff] %v1139_v63  ;;  %v1138_v4 = vmax.f32 %v1122_v0, 0.0  ;;  %v1125_v5 = vadd.f32 %v1937_v15, %v1084_v1  ;;  %v1079_v6 = vadd.f32 %v1078_v3, %v885_v2  ;;  %v1502_v7 = vpop.f32.mrf.mxu0 }
 0x20e   : > { %v1530_v8 = vpop.f32.mrf.mxu1 }
 0x20f   : > { %1154 = vst [vmem:[%s1812_s19 + $0x40] sm:$0xff] %v1138_v4  ;;  %v1141_v9 = vmax.f32 %v1125_v5, 0.0  ;;  %v1124_v10 = vadd.f32 %v1937_v15, %v1079_v6  ;;  %v1094_v11 = vadd.f32 %v1530_v8, %v1502_v7  ;;  %v895_v12 = vpop.f32.mrf.mxu0 }
 0x210   : > { %v1088_v13 = vpop.f32.mrf.mxu1 }
 0x211   : > { %1157 = vst [vmem:[%s1812_s19 + $0x58] sm:$0xff] %v1141_v9  ;;  %v1140_v14 = vmax.f32 %v1124_v10, 0.0  ;;  %v1127_v16 = vadd.f32 %v1937_v15, %v1094_v11  ;;  %v1089_v17 = vadd.f32 %v1088_v13, %v895_v12  ;;  %v1505_v18 = vpop.f32.mrf.mxu0 }
 0x212   : > { %v1533_v19 = vpop.f32.mrf.mxu1 }
 0x213   : > { %1156 = vst [vmem:[%s1812_s19 + $0x50] sm:$0xff] %v1140_v14  ;;  %v1143_v20 = vmax.f32 %v1127_v16, 0.0  ;;  %v1126_v21 = vadd.f32 %v1937_v15, %v1089_v17  ;;  %v1104_v22 = vadd.f32 %v1533_v19, %v1505_v18  ;;  %v905_v23 = vpop.f32.mrf.mxu0 }
 0x214   : > { %v1098_v24 = vpop.f32.mrf.mxu1 }
 0x215   : > { %1159 = vst [vmem:[%s1812_s19 + $0x68] sm:$0xff] %v1143_v20  ;;  %v1142_v25 = vmax.f32 %v1126_v21, 0.0  ;;  %v1129_v26 = vadd.f32 %v1937_v15, %v1104_v22  ;;  %v1099_v27 = vadd.f32 %v1098_v24, %v905_v23 }
 0x217   : > { %1158 = vst [vmem:[%s1812_s19 + $0x60] sm:$0xff] %v1142_v25  ;;  %v1145_v28 = vmax.f32 %v1129_v26, 0.0  ;;  %v1128_v29 = vadd.f32 %v1937_v15, %v1099_v27 }
 0x219   : > { %1161 = vst [vmem:[%s1812_s19 + $0x78] sm:$0xff] %v1145_v28  ;;  %v1144_v30 = vmax.f32 %v1128_v29, 0.0 }
 0x21b   : > { %1160 = vst [vmem:[%s1812_s19 + $0x70] sm:$0xff] %v1144_v30 }
 0x21c PF: > { %s16_s27 = sadd.s32 1, %s1678_s27   ;;  %s1999_s21 = smov %s1658_s22 }
 0x21d   : > { %p13_p0 = scmp.ge.s32.totalorder %s16_s27, 11   ;;  %s2000_s22 = smov %s1767_s10 }
 0x21e   : > { %s2001_s23 = smov %s1670_s25  ;;  %s2002_s24 = smov %s1674_s26 }
 0x21f   : > { %s2003_s25 = smov %s2006_s28  ;;  %s2004_s26 = smov %s2010_s29 }
 0x220   :  { %15 = sbr.rel (!%p13_p0) target bundleno = 4 (0x4), region = 134 }

</bundles_post_ra>
